<compile_context>
chip_gen: v7x
topology: tpu7x:2x2x1
jax: 0.10.0
libtpu: 0.0.40
codegen_flags: <defaults>
</compile_context>

<pallas_src>
import functools

import jax
import jax.numpy as jnp
from jax import lax
from jax.experimental import pallas as pl
from jax.experimental.pallas import tpu as pltpu

_LANE = 128
_SUBLANE = 8


def _ceil_to(x, m):
    return ((x + m - 1) // m) * m


def _pad2(x, rows, cols):
    r, c = x.shape
    return jnp.pad(x, ((0, rows - r), (0, cols - c)))


# ---------------------------------------------------------------------------
# Fused kernel: edge update -> node update -> global-attr update
# ---------------------------------------------------------------------------
def _fused_kernel(
    n_edges, n_nodes, compute_dtype,               # static (closed over)
    src_col_ref, dst_col_ref, dst_row_ref,         # int32 index vectors
    e_ref, v_ref, u_ref,                           # padded features
    ew1_vi_ref, ew1_vj_ref, ew1_e_ref, ew1_u_ref, eb1_ref, ew2_ref, eb2_ref,
    nw1_v_ref, nw1_ve_ref, nw1_u_ref, nb1_ref, nw2_ref, nb2_ref,
    aw1_u_ref, aw1_ue_ref, aw1_uv_ref, ab1_ref, aw2_ref, ab2_ref,
    e_out_ref, v_out_ref, u_out_ref,
):
    f32 = jnp.float32
    dt = compute_dtype

    def mm(a, b):
        return jnp.dot(a.astype(dt), b.astype(dt), preferred_element_type=f32)

    Ep = e_ref.shape[0]
    Np = v_ref.shape[0]

    v = v_ref[...]                                  # (Np, Dvp)
    u = u_ref[...]                                  # (1, Dap) single-graph global state

    # ---- gather v[src], v[dst] as one-hot MXU matmuls (built in VMEM) ------
    node_iota = lax.broadcasted_iota(jnp.int32, (Ep, Np), 1)
    oh_src = (src_col_ref[...] == node_iota).astype(f32)        # (Ep, Np)
    oh_dst = (dst_col_ref[...] == node_iota).astype(f32)
    vi = mm(oh_src, v)                              # (Ep, Dvp)
    vj = mm(oh_dst, v)

    # ---- edge update: split-W1 MLP, u-term folded into the bias ------------
    eb_eff = eb1_ref[...] + mm(u, ew1_u_ref[...])
    h = (mm(vi, ew1_vi_ref[...]) + mm(vj, ew1_vj_ref[...])
         + mm(e_ref[...], ew1_e_ref[...]) + eb_eff)
    h = jnp.maximum(h, 0.0)
    e_new = jnp.maximum(mm(h, ew2_ref[...]) + eb2_ref[...], 0.0)

    # zero padded edge rows so they never enter the aggregation / mean readout
    edge_valid = (lax.broadcasted_iota(jnp.int32, (Ep, 1), 0) < n_edges).astype(f32)
    e_new = e_new * edge_valid
    e_out_ref[...] = e_new

    # ---- node aggregation: mean of incoming edges by dst (in-VMEM mask) ----
    mask_ne = (lax.broadcasted_iota(jnp.int32, (Np, Ep), 0)
               == dst_row_ref[...]).astype(f32)                 # (Np, Ep)
    deg = jnp.sum(mask_ne, axis=1, keepdims=True)
    agg = mask_ne / jnp.maximum(deg, 1.0)
    ve = mm(agg, e_new)                             # (Np, Deop)

    # ---- node update --------------------------------------------------------
    nb_eff = nb1_ref[...] + mm(u, nw1_u_ref[...])
    h = mm(v, nw1_v_ref[...]) + mm(ve, nw1_ve_ref[...]) + nb_eff
    h = jnp.maximum(h, 0.0)
    v_new = jnp.maximum(mm(h, nw2_ref[...]) + nb2_ref[...], 0.0)
    node_valid = (lax.broadcasted_iota(jnp.int32, (Np, 1), 0) < n_nodes).astype(f32)
    v_new = v_new * node_valid
    v_out_ref[...] = v_new

    # ---- global-attr update: mean readouts over the TRUE E / N -------------
    ue = jnp.sum(e_new, axis=0, keepdims=True) * (1.0 / n_edges)
    uv = jnp.sum(v_new, axis=0, keepdims=True) * (1.0 / n_nodes)
    ab_eff = ab1_ref[...] + mm(u, aw1_u_ref[...])
    h = jnp.maximum(mm(ue, aw1_ue_ref[...]) + mm(uv, aw1_uv_ref[...]) + ab_eff, 0.0)
    u_out_ref[...] = jnp.maximum(mm(h, aw2_ref[...]) + ab2_ref[...], 0.0)


# ---------------------------------------------------------------------------
# Wrapper: pad/split weights, one pallas_call, slice results back
# ---------------------------------------------------------------------------
@functools.partial(jax.jit, static_argnames=("num_nodes", "compute_dtype"))
def megnet_graph_conv(src, dst, edge_feat, node_feat, graph_attr, params, *,
                      num_nodes, compute_dtype=jnp.float32):
    """Single-graph MEGNet graph convolution (edge -> node -> attr updates)."""
    E, De = edge_feat.shape
    N = int(num_nodes)
    Dv = node_feat.shape[1]
    Da = graph_attr.shape[1]

    ew1, eb1, ew2, eb2 = params["edge"]
    nw1, nb1, nw2, nb2 = params["node"]
    aw1, ab1, aw2, ab2 = params["attr"]
    He, De_out = ew1.shape[1], ew2.shape[1]
    Hn, Dv_out = nw1.shape[1], nw2.shape[1]
    Ha, Da_out = aw1.shape[1], aw2.shape[1]

    # Padded sizes: rows -> sublane multiple, feature/hidden dims -> lane-dense 128.
    Ep, Np = _ceil_to(E, _SUBLANE), _ceil_to(N, _SUBLANE)
    Dvp, Dep, Dap = (_ceil_to(d, _LANE) for d in (Dv, De, Da))
    Hep, Hnp, Hap = (_ceil_to(d, _LANE) for d in (He, Hn, Ha))
    Deop, Dvop, Daop = (_ceil_to(d, _LANE) for d in (De_out, Dv_out, Da_out))

    # Index vectors (padded entries = -1 so they never match a node id).
    src_col = jnp.pad(src.astype(jnp.int32), (0, Ep - E), constant_values=-1)[:, None]
    dst_p = jnp.pad(dst.astype(jnp.int32), (0, Ep - E), constant_values=-1)
    dst_col = dst_p[:, None]
    dst_row = dst_p[None, :]

    # Zero-padded, lane-dense feature tensors.
    e_p = _pad2(edge_feat, Ep, Dep)
    v_p = _pad2(node_feat, Np, Dvp)
    u_p = _pad2(graph_attr, 1, Dap)

    # Split each W1 row-wise (hstack order of the reference module) and zero-pad.
    ew1_vi = _pad2(ew1[:Dv], Dvp, Hep)
    ew1_vj = _pad2(ew1[Dv:2 * Dv], Dvp, Hep)
    ew1_e = _pad2(ew1[2 * Dv:2 * Dv + De], Dep, Hep)
    ew1_u = _pad2(ew1[2 * Dv + De:], Dap, Hep)
    eb1_p = _pad2(eb1, 1, Hep)
    ew2_p = _pad2(ew2, Hep, Deop)
    eb2_p = _pad2(eb2, 1, Deop)

    nw1_v = _pad2(nw1[:Dv], Dvp, Hnp)
    nw1_ve = _pad2(nw1[Dv:Dv + De_out], Deop, Hnp)
    nw1_u = _pad2(nw1[Dv + De_out:], Dap, Hnp)
    nb1_p = _pad2(nb1, 1, Hnp)
    nw2_p = _pad2(nw2, Hnp, Dvop)
    nb2_p = _pad2(nb2, 1, Dvop)

    aw1_u = _pad2(aw1[:Da], Dap, Hap)
    aw1_ue = _pad2(aw1[Da:Da + De_out], Deop, Hap)
    aw1_uv = _pad2(aw1[Da + De_out:], Dvop, Hap)
    ab1_p = _pad2(ab1, 1, Hap)
    aw2_p = _pad2(aw2, Hap, Daop)
    ab2_p = _pad2(ab2, 1, Daop)

    args = (src_col, dst_col, dst_row, e_p, v_p, u_p,
            ew1_vi, ew1_vj, ew1_e, ew1_u, eb1_p, ew2_p, eb2_p,
            nw1_v, nw1_ve, nw1_u, nb1_p, nw2_p, nb2_p,
            aw1_u, aw1_ue, aw1_uv, ab1_p, aw2_p, ab2_p)

    kernel = functools.partial(_fused_kernel, E, N, compute_dtype)

    flops = 2 * (
        2 * Ep * Np * Dvp                                   # one-hot gathers
        + Ep * Hep * (2 * Dvp + Dep) + Ep * Hep * Deop      # edge MLP
        + Np * Ep * Deop                                    # incoming-edge mean
        + Np * Hnp * (Dvp + Deop) + Np * Hnp * Dvop         # node MLP
        + Hap * (Dap + Deop + Dvop) + Hap * Daop            # attr MLP
    )
    bytes_accessed = 4 * sum(int(a.size) for a in args) + 4 * (Ep * Deop + Np * Dvop + Daop)

    vmem_spec = pl.BlockSpec(memory_space=pltpu.MemorySpace.VMEM)
    e_out, v_out, u_out = pl.pallas_call(
        kernel,
        out_shape=(
            jax.ShapeDtypeStruct((Ep, Deop), jnp.float32),
            jax.ShapeDtypeStruct((Np, Dvop), jnp.float32),
            jax.ShapeDtypeStruct((1, Daop), jnp.float32),
        ),
        in_specs=[vmem_spec] * len(args),
        out_specs=(vmem_spec, vmem_spec, vmem_spec),
        compiler_params=pltpu.CompilerParams(vmem_limit_bytes=32 * 1024 * 1024),
        cost_estimate=pl.CostEstimate(flops=flops, transcendentals=0,
                                      bytes_accessed=bytes_accessed),
    )(*args)

    return e_out[:E, :De_out], v_out[:N, :Dv_out], u_out[:, :Da_out]


# ---------------------------------------------------------------------------
# Deterministic parameter init + pure-JAX reference check
# ---------------------------------------------------------------------------
def _init_mlp(key, d_in, d_hidden, d_out):
    k1, k2 = jax.random.split(key)
    w1 = 0.1 * jax.random.normal(k1, (d_in, d_hidden), jnp.float32)
    b1 = jnp.zeros((1, d_hidden), jnp.float32)
    w2 = 0.1 * jax.random.normal(k2, (d_hidden, d_out), jnp.float32)
    b2 = jnp.zeros((1, d_out), jnp.float32)
    return (w1, b1, w2, b2)


def _reference(src, dst, e, v, u, params, num_nodes):
    def mlp(x, p):
        w1, b1, w2, b2 = p
        return jnp.maximum(jnp.maximum(x @ w1 + b1, 0.0) @ w2 + b2, 0.0)

    N = num_nodes
    u_nodes = jnp.broadcast_to(u, (N, u.shape[1]))
    x_e = jnp.concatenate([v[src], v[dst], e, u_nodes[src]], axis=1)
    e_new = mlp(x_e, params["edge"])
    onehot = (dst[None, :] == jnp.arange(N)[:, None]).astype(jnp.float32)
    deg = jnp.maximum(onehot.sum(1, keepdims=True), 1.0)
    ve = (onehot / deg) @ e_new
    v_new = mlp(jnp.concatenate([v, ve, u_nodes], axis=1), params["node"])
    ue = e_new.mean(0, keepdims=True)
    uv = v_new.mean(0, keepdims=True)
    u_new = mlp(jnp.concatenate([u, ue, uv], axis=1), params["attr"])
    return e_new, v_new, u_new


if __name__ == "__main__":
    key = jax.random.PRNGKey(0)
    N, E = 8, 16            # nodes, edges (single graph)
    DV, DE, DA = 16, 16, 8  # node / edge / attr feature dims
    H = 32                  # hidden width of each MLP
    DV_OUT, DE_OUT, DA_OUT = 16, 16, 8

    ks = jax.random.split(key, 8)
    src = jax.random.randint(ks[0], (E,), 0, N, dtype=jnp.int32)
    dst = jax.random.randint(ks[1], (E,), 0, N, dtype=jnp.int32)
    edge_feat = jax.random.normal(ks[2], (E, DE), jnp.float32)
    node_feat = jax.random.normal(ks[3], (N, DV), jnp.float32)
    graph_attr = jax.random.normal(ks[4], (1, DA), jnp.float32)

    params = {
        "edge": _init_mlp(ks[5], 2 * DV + DE + DA, H, DE_OUT),
        "node": _init_mlp(ks[6], DV + DE_OUT + DA, H, DV_OUT),
        "attr": _init_mlp(ks[7], DA + DE_OUT + DV_OUT, H, DA_OUT),
    }

    e_new, v_new, u_new = megnet_graph_conv(
        src, dst, edge_feat, node_feat, graph_attr, params, num_nodes=N)
    jax.block_until_ready((e_new, v_new, u_new))

    e_ref, v_ref, u_ref = _reference(src, dst, edge_feat, node_feat, graph_attr, params, N)
    assert jnp.allclose(e_new, e_ref, atol=1e-4)
    assert jnp.allclose(v_new, v_ref, atol=1e-4)
    assert jnp.allclose(u_new, u_ref, atol=1e-4)

    print("KERNEL_OK")
</pallas_src>

<mosaic_0001>
module attributes {stable_mosaic.version = 11 : i64} {
  func.func @_fused_kernel(%arg0: memref<16x1xi32, #tpu.memory_space<vmem>>, %arg1: memref<16x1xi32, #tpu.memory_space<vmem>>, %arg2: memref<1x16xi32, #tpu.memory_space<vmem>>, %arg3: memref<16x128xf32, #tpu.memory_space<vmem>>, %arg4: memref<8x128xf32, #tpu.memory_space<vmem>>, %arg5: memref<1x128xf32, #tpu.memory_space<vmem>>, %arg6: memref<128x128xf32, #tpu.memory_space<vmem>>, %arg7: memref<128x128xf32, #tpu.memory_space<vmem>>, %arg8: memref<128x128xf32, #tpu.memory_space<vmem>>, %arg9: memref<128x128xf32, #tpu.memory_space<vmem>>, %arg10: memref<1x128xf32, #tpu.memory_space<vmem>>, %arg11: memref<128x128xf32, #tpu.memory_space<vmem>>, %arg12: memref<1x128xf32, #tpu.memory_space<vmem>>, %arg13: memref<128x128xf32, #tpu.memory_space<vmem>>, %arg14: memref<128x128xf32, #tpu.memory_space<vmem>>, %arg15: memref<128x128xf32, #tpu.memory_space<vmem>>, %arg16: memref<1x128xf32, #tpu.memory_space<vmem>>, %arg17: memref<128x128xf32, #tpu.memory_space<vmem>>, %arg18: memref<1x128xf32, #tpu.memory_space<vmem>>, %arg19: memref<128x128xf32, #tpu.memory_space<vmem>>, %arg20: memref<128x128xf32, #tpu.memory_space<vmem>>, %arg21: memref<128x128xf32, #tpu.memory_space<vmem>>, %arg22: memref<1x128xf32, #tpu.memory_space<vmem>>, %arg23: memref<128x128xf32, #tpu.memory_space<vmem>>, %arg24: memref<1x128xf32, #tpu.memory_space<vmem>>, %arg25: memref<16x128xf32, #tpu.memory_space<vmem>>, %arg26: memref<8x128xf32, #tpu.memory_space<vmem>>, %arg27: memref<1x128xf32, #tpu.memory_space<vmem>>) attributes {dimension_semantics = [], scalar_prefetch = 0 : i64, scratch_operands = 0 : i64, tpu.core_type = #tpu.core_type<tc>} {
    %c0 = arith.constant 0 : index
    %c0_0 = arith.constant 0 : index
    %0 = vector.load %arg4[%c0, %c0_0] : memref<8x128xf32, #tpu.memory_space<vmem>>, vector<8x128xf32>
    %c0_1 = arith.constant 0 : index
    %c0_2 = arith.constant 0 : index
    %1 = vector.load %arg5[%c0_1, %c0_2] : memref<1x128xf32, #tpu.memory_space<vmem>>, vector<1x128xf32>
    %2 = tpu.iota {dimensions = array<i32: 1>} : vector<16x8xi32>
    %c0_3 = arith.constant 0 : index
    %c0_4 = arith.constant 0 : index
    %3 = vector.load %arg0[%c0_3, %c0_4] : memref<16x1xi32, #tpu.memory_space<vmem>>, vector<16x1xi32>
    %4 = vector.broadcast %3 : vector<16x1xi32> to vector<16x8xi32>
    %5 = arith.cmpi eq, %4, %2 : vector<16x8xi32>
    %6 = arith.extui %5 : vector<16x8xi1> to vector<16x8xi32>
    %7 = arith.sitofp %6 : vector<16x8xi32> to vector<16x8xf32>
    %c0_5 = arith.constant 0 : index
    %c0_6 = arith.constant 0 : index
    %8 = vector.load %arg1[%c0_5, %c0_6] : memref<16x1xi32, #tpu.memory_space<vmem>>, vector<16x1xi32>
    %9 = vector.broadcast %8 : vector<16x1xi32> to vector<16x8xi32>
    %10 = arith.cmpi eq, %9, %2 : vector<16x8xi32>
    %11 = arith.extui %10 : vector<16x8xi1> to vector<16x8xi32>
    %12 = arith.sitofp %11 : vector<16x8xi32> to vector<16x8xf32>
    %cst = arith.constant dense<0.000000e+00> : vector<16x128xf32>
    %13 = tpu.matmul %7, %0, %cst {dimension_numbers = #tpu.dot_dimension_numbers<[1], [0], [0], [1], [0, 0, 1, 1], [], []>} : vector<16x8xf32>, vector<8x128xf32>, vector<16x128xf32> -> vector<16x128xf32>
    %cst_7 = arith.constant dense<0.000000e+00> : vector<16x128xf32>
    %14 = tpu.matmul %12, %0, %cst_7 {dimension_numbers = #tpu.dot_dimension_numbers<[1], [0], [0], [1], [0, 0, 1, 1], [], []>} : vector<16x8xf32>, vector<8x128xf32>, vector<16x128xf32> -> vector<16x128xf32>
    %c0_8 = arith.constant 0 : index
    %c0_9 = arith.constant 0 : index
    %15 = vector.load %arg10[%c0_8, %c0_9] : memref<1x128xf32, #tpu.memory_space<vmem>>, vector<1x128xf32>
    %c0_10 = arith.constant 0 : index
    %c0_11 = arith.constant 0 : index
    %16 = vector.load %arg9[%c0_10, %c0_11] : memref<128x128xf32, #tpu.memory_space<vmem>>, vector<128x128xf32>
    %cst_12 = arith.constant dense<0.000000e+00> : vector<1x128xf32>
    %17 = tpu.matmul %1, %16, %cst_12 {dimension_numbers = #tpu.dot_dimension_numbers<[1], [0], [0], [1], [0, 0, 1, 1], [], []>} : vector<1x128xf32>, vector<128x128xf32>, vector<1x128xf32> -> vector<1x128xf32>
    %18 = arith.addf %15, %17 : vector<1x128xf32>
    %c0_13 = arith.constant 0 : index
    %c0_14 = arith.constant 0 : index
    %19 = vector.load %arg6[%c0_13, %c0_14] : memref<128x128xf32, #tpu.memory_space<vmem>>, vector<128x128xf32>
    %cst_15 = arith.constant dense<0.000000e+00> : vector<16x128xf32>
    %20 = tpu.matmul %13, %19, %cst_15 {dimension_numbers = #tpu.dot_dimension_numbers<[1], [0], [0], [1], [0, 0, 1, 1], [], []>} : vector<16x128xf32>, vector<128x128xf32>, vector<16x128xf32> -> vector<16x128xf32>
    %c0_16 = arith.constant 0 : index
    %c0_17 = arith.constant 0 : index
    %21 = vector.load %arg7[%c0_16, %c0_17] : memref<128x128xf32, #tpu.memory_space<vmem>>, vector<128x128xf32>
    %cst_18 = arith.constant dense<0.000000e+00> : vector<16x128xf32>
    %22 = tpu.matmul %14, %21, %cst_18 {dimension_numbers = #tpu.dot_dimension_numbers<[1], [0], [0], [1], [0, 0, 1, 1], [], []>} : vector<16x128xf32>, vector<128x128xf32>, vector<16x128xf32> -> vector<16x128xf32>
    %23 = arith.addf %20, %22 : vector<16x128xf32>
    %c0_19 = arith.constant 0 : index
    %c0_20 = arith.constant 0 : index
    %24 = vector.load %arg3[%c0_19, %c0_20] : memref<16x128xf32, #tpu.memory_space<vmem>>, vector<16x128xf32>
    %c0_21 = arith.constant 0 : index
    %c0_22 = arith.constant 0 : index
    %25 = vector.load %arg8[%c0_21, %c0_22] : memref<128x128xf32, #tpu.memory_space<vmem>>, vector<128x128xf32>
    %cst_23 = arith.constant dense<0.000000e+00> : vector<16x128xf32>
    %26 = tpu.matmul %24, %25, %cst_23 {dimension_numbers = #tpu.dot_dimension_numbers<[1], [0], [0], [1], [0, 0, 1, 1], [], []>} : vector<16x128xf32>, vector<128x128xf32>, vector<16x128xf32> -> vector<16x128xf32>
    %27 = arith.addf %23, %26 : vector<16x128xf32>
    %28 = vector.broadcast %18 : vector<1x128xf32> to vector<16x128xf32>
    %29 = arith.addf %27, %28 : vector<16x128xf32>
    %cst_24 = arith.constant 0.000000e+00 : f32
    %30 = vector.broadcast %cst_24 : f32 to vector<16x128xf32>
    %31 = arith.maximumf %29, %30 : vector<16x128xf32>
    %c0_25 = arith.constant 0 : index
    %c0_26 = arith.constant 0 : index
    %32 = vector.load %arg11[%c0_25, %c0_26] : memref<128x128xf32, #tpu.memory_space<vmem>>, vector<128x128xf32>
    %cst_27 = arith.constant dense<0.000000e+00> : vector<16x128xf32>
    %33 = tpu.matmul %31, %32, %cst_27 {dimension_numbers = #tpu.dot_dimension_numbers<[1], [0], [0], [1], [0, 0, 1, 1], [], []>} : vector<16x128xf32>, vector<128x128xf32>, vector<16x128xf32> -> vector<16x128xf32>
    %c0_28 = arith.constant 0 : index
    %c0_29 = arith.constant 0 : index
    %34 = vector.load %arg12[%c0_28, %c0_29] : memref<1x128xf32, #tpu.memory_space<vmem>>, vector<1x128xf32>
    %35 = vector.broadcast %34 : vector<1x128xf32> to vector<16x128xf32>
    %36 = arith.addf %33, %35 : vector<16x128xf32>
    %cst_30 = arith.constant 0.000000e+00 : f32
    %37 = vector.broadcast %cst_30 : f32 to vector<16x128xf32>
    %38 = arith.maximumf %36, %37 : vector<16x128xf32>
    %39 = tpu.iota {dimensions = array<i32: 0>} : vector<16x1xi32>
    %c16_i32 = arith.constant 16 : i32
    %40 = vector.broadcast %c16_i32 : i32 to vector<16x1xi32>
    %41 = arith.cmpi slt, %39, %40 : vector<16x1xi32>
    %42 = arith.extui %41 : vector<16x1xi1> to vector<16x1xi32>
    %43 = arith.sitofp %42 : vector<16x1xi32> to vector<16x1xf32>
    %44 = vector.broadcast %43 : vector<16x1xf32> to vector<16x128xf32>
    %45 = arith.mulf %38, %44 : vector<16x128xf32>
    %c0_31 = arith.constant 0 : index
    %c0_32 = arith.constant 0 : index
    %46 = vector.load %arg25[%c0_31, %c0_32] : memref<16x128xf32, #tpu.memory_space<vmem>>, vector<16x128xf32>
    tpu.vector_store %arg25[%c0_31, %c0_32], %45 {strides = array<i32>} : memref<16x128xf32, #tpu.memory_space<vmem>>, vector<16x128xf32>,
    %47 = tpu.iota {dimensions = array<i32: 0>} : vector<8x16xi32>
    %c0_33 = arith.constant 0 : index
    %c0_34 = arith.constant 0 : index
    %48 = vector.load %arg2[%c0_33, %c0_34] : memref<1x16xi32, #tpu.memory_space<vmem>>, vector<1x16xi32>
    %49 = vector.broadcast %48 : vector<1x16xi32> to vector<8x16xi32>
    %50 = arith.cmpi eq, %47, %49 : vector<8x16xi32>
    %51 = arith.extui %50 : vector<8x16xi1> to vector<8x16xi32>
    %52 = arith.sitofp %51 : vector<8x16xi32> to vector<8x16xf32>
    %cst_35 = arith.constant dense<0.000000e+00> : vector<8xf32>
    %53 = vector.multi_reduction <add>, %52, %cst_35 [1] : vector<8x16xf32> to vector<8xf32>
    %54 = vector.shape_cast %53 : vector<8xf32> to vector<8x1xf32>
    %cst_36 = arith.constant 1.000000e+00 : f32
    %55 = vector.broadcast %cst_36 : f32 to vector<8x1xf32>
    %56 = arith.maximumf %54, %55 : vector<8x1xf32>
    %57 = vector.broadcast %56 : vector<8x1xf32> to vector<8x16xf32>
    %58 = arith.divf %52, %57 : vector<8x16xf32>
    %cst_37 = arith.constant dense<0.000000e+00> : vector<8x128xf32>
    %59 = tpu.matmul %58, %45, %cst_37 {dimension_numbers = #tpu.dot_dimension_numbers<[1], [0], [0], [1], [0, 0, 1, 1], [], []>} : vector<8x16xf32>, vector<16x128xf32>, vector<8x128xf32> -> vector<8x128xf32>
    %c0_38 = arith.constant 0 : index
    %c0_39 = arith.constant 0 : index
    %60 = vector.load %arg16[%c0_38, %c0_39] : memref<1x128xf32, #tpu.memory_space<vmem>>, vector<1x128xf32>
    %c0_40 = arith.constant 0 : index
    %c0_41 = arith.constant 0 : index
    %61 = vector.load %arg15[%c0_40, %c0_41] : memref<128x128xf32, #tpu.memory_space<vmem>>, vector<128x128xf32>
    %cst_42 = arith.constant dense<0.000000e+00> : vector<1x128xf32>
    %62 = tpu.matmul %1, %61, %cst_42 {dimension_numbers = #tpu.dot_dimension_numbers<[1], [0], [0], [1], [0, 0, 1, 1], [], []>} : vector<1x128xf32>, vector<128x128xf32>, vector<1x128xf32> -> vector<1x128xf32>
    %63 = arith.addf %60, %62 : vector<1x128xf32>
    %c0_43 = arith.constant 0 : index
    %c0_44 = arith.constant 0 : index
    %64 = vector.load %arg13[%c0_43, %c0_44] : memref<128x128xf32, #tpu.memory_space<vmem>>, vector<128x128xf32>
    %cst_45 = arith.constant dense<0.000000e+00> : vector<8x128xf32>
    %65 = tpu.matmul %0, %64, %cst_45 {dimension_numbers = #tpu.dot_dimension_numbers<[1], [0], [0], [1], [0, 0, 1, 1], [], []>} : vector<8x128xf32>, vector<128x128xf32>, vector<8x128xf32> -> vector<8x128xf32>
    %c0_46 = arith.constant 0 : index
    %c0_47 = arith.constant 0 : index
    %66 = vector.load %arg14[%c0_46, %c0_47] : memref<128x128xf32, #tpu.memory_space<vmem>>, vector<128x128xf32>
    %cst_48 = arith.constant dense<0.000000e+00> : vector<8x128xf32>
    %67 = tpu.matmul %59, %66, %cst_48 {dimension_numbers = #tpu.dot_dimension_numbers<[1], [0], [0], [1], [0, 0, 1, 1], [], []>} : vector<8x128xf32>, vector<128x128xf32>, vector<8x128xf32> -> vector<8x128xf32>
    %68 = arith.addf %65, %67 : vector<8x128xf32>
    %69 = vector.broadcast %63 : vector<1x128xf32> to vector<8x128xf32>
    %70 = arith.addf %68, %69 : vector<8x128xf32>
    %cst_49 = arith.constant 0.000000e+00 : f32
    %71 = vector.broadcast %cst_49 : f32 to vector<8x128xf32>
    %72 = arith.maximumf %70, %71 : vector<8x128xf32>
    %c0_50 = arith.constant 0 : index
    %c0_51 = arith.constant 0 : index
    %73 = vector.load %arg17[%c0_50, %c0_51] : memref<128x128xf32, #tpu.memory_space<vmem>>, vector<128x128xf32>
    %cst_52 = arith.constant dense<0.000000e+00> : vector<8x128xf32>
    %74 = tpu.matmul %72, %73, %cst_52 {dimension_numbers = #tpu.dot_dimension_numbers<[1], [0], [0], [1], [0, 0, 1, 1], [], []>} : vector<8x128xf32>, vector<128x128xf32>, vector<8x128xf32> -> vector<8x128xf32>
    %c0_53 = arith.constant 0 : index
    %c0_54 = arith.constant 0 : index
    %75 = vector.load %arg18[%c0_53, %c0_54] : memref<1x128xf32, #tpu.memory_space<vmem>>, vector<1x128xf32>
    %76 = vector.broadcast %75 : vector<1x128xf32> to vector<8x128xf32>
    %77 = arith.addf %74, %76 : vector<8x128xf32>
    %cst_55 = arith.constant 0.000000e+00 : f32
    %78 = vector.broadcast %cst_55 : f32 to vector<8x128xf32>
    %79 = arith.maximumf %77, %78 : vector<8x128xf32>
    %80 = tpu.iota {dimensions = array<i32: 0>} : vector<8x1xi32>
    %c8_i32 = arith.constant 8 : i32
    %81 = vector.broadcast %c8_i32 : i32 to vector<8x1xi32>
    %82 = arith.cmpi slt, %80, %81 : vector<8x1xi32>
    %83 = arith.extui %82 : vector<8x1xi1> to vector<8x1xi32>
    %84 = arith.sitofp %83 : vector<8x1xi32> to vector<8x1xf32>
    %85 = vector.broadcast %84 : vector<8x1xf32> to vector<8x128xf32>
    %86 = arith.mulf %79, %85 : vector<8x128xf32>
    %c0_56 = arith.constant 0 : index
    %c0_57 = arith.constant 0 : index
    %87 = vector.load %arg26[%c0_56, %c0_57] : memref<8x128xf32, #tpu.memory_space<vmem>>, vector<8x128xf32>
    tpu.vector_store %arg26[%c0_56, %c0_57], %86 {strides = array<i32>} : memref<8x128xf32, #tpu.memory_space<vmem>>, vector<8x128xf32>,
    %cst_58 = arith.constant dense<0.000000e+00> : vector<128xf32>
    %88 = vector.multi_reduction <add>, %45, %cst_58 [0] : vector<16x128xf32> to vector<128xf32>
    %89 = vector.shape_cast %88 : vector<128xf32> to vector<1x128xf32>
    %cst_59 = arith.constant 6.250000e-02 : f32
    %90 = vector.broadcast %cst_59 : f32 to vector<1x128xf32>
    %91 = arith.mulf %89, %90 : vector<1x128xf32>
    %cst_60 = arith.constant dense<0.000000e+00> : vector<128xf32>
    %92 = vector.multi_reduction <add>, %86, %cst_60 [0] : vector<8x128xf32> to vector<128xf32>
    %93 = vector.shape_cast %92 : vector<128xf32> to vector<1x128xf32>
    %cst_61 = arith.constant 1.250000e-01 : f32
    %94 = vector.broadcast %cst_61 : f32 to vector<1x128xf32>
    %95 = arith.mulf %93, %94 : vector<1x128xf32>
    %c0_62 = arith.constant 0 : index
    %c0_63 = arith.constant 0 : index
    %96 = vector.load %arg22[%c0_62, %c0_63] : memref<1x128xf32, #tpu.memory_space<vmem>>, vector<1x128xf32>
    %c0_64 = arith.constant 0 : index
    %c0_65 = arith.constant 0 : index
    %97 = vector.load %arg19[%c0_64, %c0_65] : memref<128x128xf32, #tpu.memory_space<vmem>>, vector<128x128xf32>
    %cst_66 = arith.constant dense<0.000000e+00> : vector<1x128xf32>
    %98 = tpu.matmul %1, %97, %cst_66 {dimension_numbers = #tpu.dot_dimension_numbers<[1], [0], [0], [1], [0, 0, 1, 1], [], []>} : vector<1x128xf32>, vector<128x128xf32>, vector<1x128xf32> -> vector<1x128xf32>
    %99 = arith.addf %96, %98 : vector<1x128xf32>
    %c0_67 = arith.constant 0 : index
    %c0_68 = arith.constant 0 : index
    %100 = vector.load %arg20[%c0_67, %c0_68] : memref<128x128xf32, #tpu.memory_space<vmem>>, vector<128x128xf32>
    %cst_69 = arith.constant dense<0.000000e+00> : vector<1x128xf32>
    %101 = tpu.matmul %91, %100, %cst_69 {dimension_numbers = #tpu.dot_dimension_numbers<[1], [0], [0], [1], [0, 0, 1, 1], [], []>} : vector<1x128xf32>, vector<128x128xf32>, vector<1x128xf32> -> vector<1x128xf32>
    %c0_70 = arith.constant 0 : index
    %c0_71 = arith.constant 0 : index
    %102 = vector.load %arg21[%c0_70, %c0_71] : memref<128x128xf32, #tpu.memory_space<vmem>>, vector<128x128xf32>
    %cst_72 = arith.constant dense<0.000000e+00> : vector<1x128xf32>
    %103 = tpu.matmul %95, %102, %cst_72 {dimension_numbers = #tpu.dot_dimension_numbers<[1], [0], [0], [1], [0, 0, 1, 1], [], []>} : vector<1x128xf32>, vector<128x128xf32>, vector<1x128xf32> -> vector<1x128xf32>
    %104 = arith.addf %101, %103 : vector<1x128xf32>
    %105 = arith.addf %104, %99 : vector<1x128xf32>
    %cst_73 = arith.constant 0.000000e+00 : f32
    %106 = vector.broadcast %cst_73 : f32 to vector<1x128xf32>
    %107 = arith.maximumf %105, %106 : vector<1x128xf32>
    %c0_74 = arith.constant 0 : index
    %c0_75 = arith.constant 0 : index
    %108 = vector.load %arg23[%c0_74, %c0_75] : memref<128x128xf32, #tpu.memory_space<vmem>>, vector<128x128xf32>
    %cst_76 = arith.constant dense<0.000000e+00> : vector<1x128xf32>
    %109 = tpu.matmul %107, %108, %cst_76 {dimension_numbers = #tpu.dot_dimension_numbers<[1], [0], [0], [1], [0, 0, 1, 1], [], []>} : vector<1x128xf32>, vector<128x128xf32>, vector<1x128xf32> -> vector<1x128xf32>
    %c0_77 = arith.constant 0 : index
    %c0_78 = arith.constant 0 : index
    %110 = vector.load %arg24[%c0_77, %c0_78] : memref<1x128xf32, #tpu.memory_space<vmem>>, vector<1x128xf32>
    %111 = arith.addf %109, %110 : vector<1x128xf32>
    %cst_79 = arith.constant 0.000000e+00 : f32
    %112 = vector.broadcast %cst_79 : f32 to vector<1x128xf32>
    %113 = arith.maximumf %111, %112 : vector<1x128xf32>
    %c0_80 = arith.constant 0 : index
    %c0_81 = arith.constant 0 : index
    %114 = vector.load %arg27[%c0_80, %c0_81] : memref<1x128xf32, #tpu.memory_space<vmem>>, vector<1x128xf32>
    tpu.vector_store %arg27[%c0_80, %c0_81], %113 {strides = array<i32>} : memref<1x128xf32, #tpu.memory_space<vmem>>, vector<1x128xf32>,
    return
  }
}

</mosaic_0001>

<bundles_post_ra>
// kernel: megnet_graph_conv.1
= control target key start
LH: loop header
LB: loop body
LE: loop exit
PB: predicated region body
PF: predicated region fallthrough
CT: control target
= control target key end

     0   :  { %s3783_s0 = inlined_call_operand.vmem [shape: s32[16,1], index: 0, kind: input, shape index: {}]   ;;  %s3784_s1 = inlined_call_operand.vmem [shape: s32[16,1], index: 1, kind: input, shape index: {}]   ;;  %s3785_s2 = inlined_call_operand.vmem [shape: s32[1,16], index: 2, kind: input, shape index: {}]   ;;  %s3786_s3 = inlined_call_operand.vmem [shape: f32[16,128], index: 3, kind: input, shape index: {}]   ;;  %s3787_s4 = inlined_call_operand.vmem [shape: f32[8,128], index: 4, kind: input, shape index: {}]   ;;  %s3788_s5 = inlined_call_operand.vmem [shape: f32[1,128], index: 5, kind: input, shape index: {}]   ;;  %s3789_s6 = inlined_call_operand.vmem [shape: f32[128,128], index: 6, kind: input, shape index: {}]   ;;  %s3790_s7 = inlined_call_operand.vmem [shape: f32[128,128], index: 7, kind: input, shape index: {}]   ;;  %s3791_s8 = inlined_call_operand.vmem [shape: f32[128,128], index: 8, kind: input, shape index: {}]   ;;  %s3792_s9 = inlined_call_operand.vmem [shape: f32[128,128], index: 9, kind: input, shape index: {}]   ;;  %s3793_s10 = inlined_call_operand.vmem [shape: f32[1,128], index: 10, kind: input, shape index: {}]   ;;  %s3794_s11 = inlined_call_operand.vmem [shape: f32[128,128], index: 11, kind: input, shape index: {}]   ;;  %s3795_s12 = inlined_call_operand.vmem [shape: f32[1,128], index: 12, kind: input, shape index: {}]   ;;  %s3796_s13 = inlined_call_operand.vmem [shape: f32[128,128], index: 13, kind: input, shape index: {}]   ;;  %s3797_s14 = inlined_call_operand.vmem [shape: f32[128,128], index: 14, kind: input, shape index: {}]   ;;  %s3798_s15 = inlined_call_operand.vmem [shape: f32[128,128], index: 15, kind: input, shape index: {}]   ;;  %s3799_s16 = inlined_call_operand.vmem [shape: f32[1,128], index: 16, kind: input, shape index: {}]   ;;  %s3800_s17 = inlined_call_operand.vmem [shape: f32[128,128], index: 17, kind: input, shape index: {}]   ;;  %s3801_s18 = inlined_call_operand.vmem [shape: f32[1,128], index: 18, kind: input, shape index: {}]   ;;  %s3802_s19 = inlined_call_operand.vmem [shape: f32[128,128], index: 19, kind: input, shape index: {}]   ;;  %s3803_s20 = inlined_call_operand.vmem [shape: f32[128,128], index: 20, kind: input, shape index: {}]   ;;  %s3804_s21 = inlined_call_operand.vmem [shape: f32[128,128], index: 21, kind: input, shape index: {}]   ;;  %s3805_s22 = inlined_call_operand.vmem [shape: f32[1,128], index: 22, kind: input, shape index: {}]   ;;  %s3806_s23 = inlined_call_operand.vmem [shape: f32[128,128], index: 23, kind: input, shape index: {}]   ;;  %s3807_s24 = inlined_call_operand.vmem [shape: f32[1,128], index: 24, kind: input, shape index: {}]   ;;  %s3808_s25 = inlined_call_operand.hbm [shape: f32[16,128], index: 25, kind: output, shape index: {0}]   ;;  %s3809_s26 = inlined_call_operand.hbm [shape: f32[8,128], index: 26, kind: output, shape index: {1}]   ;;  %s3810_s27 = inlined_call_operand.hbm [shape: f32[1,128], index: 27, kind: output, shape index: {2}]  }
   0x1   :  { %3819 = sst [smem:[#allocation9_spill]] %s3783_s0 }
   0x2   :  { %3820 = sst [smem:[#allocation10_spill]] %s3784_s1 }
   0x3   :  { %3821 = sst [smem:[#allocation11_spill]] %s3785_s2 }
   0x4   :  { %3822 = sst [smem:[#allocation12_spill]] %s3786_s3 }
   0x5   :  { %3823 = sst [smem:[#allocation13_spill]] %s3787_s4 }
   0x6   :  { %3824 = sst [smem:[#allocation14_spill]] %s3788_s5 }
   0x7   :  { %3825 = sst [smem:[#allocation15_spill]] %s3789_s6 }
   0x8   :  { %3826 = sst [smem:[#allocation16_spill]] %s3790_s7 }
   0x9   :  { %3827 = sst [smem:[#allocation17_spill]] %s3791_s8 }
   0xa   :  { %3828 = sst [smem:[#allocation18_spill]] %s3792_s9 }
   0xb   :  { %3829 = sst [smem:[#allocation19_spill]] %s3793_s10 }
   0xc   :  { %3830 = sst [smem:[#allocation20_spill]] %s3794_s11 }
   0xd   :  { %33 = vsyncpa [#allocation3], 0  ;;  %s3831_s8 = sld [smem:[#allocation10_spill]]  ;;  %s3832_s5 = sld [smem:[#allocation9_spill]]  ;;  %v2790_v2 = vmov 0  }
   0xe   :  { %2717 = vset.pattern.permute.xlu1 %v2790_v2  ;;  %2716 = vset.pattern.permute.xlu0 %v2790_v2 }
  0x13   :  { %v103_v0 = vld [vmem:[%s3831_s8] sm:$0xff] }
  0x14   :  { %v89_v1 = vld [vmem:[%s3832_s5] sm:$0xff] }
  0x15   :  { %34 = vsyncpa [#allocation5], 0  ;;  %106 = vperm.xlu1 %2717, %v103_v0   ;;  %92 = vperm.xlu0 %2716, %v89_v1   ;;  %v104_v3 = vld [vmem:[%s3831_s8 + $0x8] sm:$0xff]  ;;  %s3833_s11 = sld [smem:[#allocation13_spill]]  ;;  %s3834_s7 = sld [smem:[#allocation18_spill]]  ;;  %v2791_v9 = vmov 0.0|0.0   ;;  %v87_v54 = vlaneseq }
  0x16   :  { %v90_v4 = vld [vmem:[%s3832_s5 + $0x8] sm:$0xff]  ;;  %2351 = vmatprep.subr.bf16.mxu1 %v2791_v9  ;;  %vm2792_vm0 = vmmov 0   ;;  %v2793_v12 = vmov 0.0   ;;  %s3835_s5 = sld [smem:[#allocation16_spill]]  ;;  %s3836_s2 = sld [smem:[#allocation14_spill]]  ;;  %vm117_vm1 = vcmask 64512  }
  0x17   :  { %1921 = vmatprep.mubr.msk.f32.mxu1 %vm2792_vm0, %v2793_v12  ;;  %v88_v55 = vand.u32 127, %v87_v54  ;;  %s3838_s30 = sld [smem:[#allocation20_spill]]  ;;  %s3839_s10 = sld [smem:[#allocation17_spill]]  ;;  %vm776_vm6 = vcmask 130048  }
  0x18   :  { %s3840_s8 = sld [smem:[#allocation12_spill]]  ;;  %s3841_s6 = sld [smem:[#allocation11_spill]] }
  0x19   :  { %109 = vperm.xlu1 %2717, %v104_v3   ;;  %95 = vperm.xlu0 %2716, %v90_v4   ;;  %s2795_s29 = smov [#allocation2]  }
  0x1b   :  { %v2954_v5 = vld [vmem:[%s3833_s11] sm:$0xff]  ;;  %v282_v7 = vld [vmem:[%s3834_s7 + $0x8] sm:$0xff]  ;;  %v283_v8 = vld [vmem:[%s3834_s7 + $0x10] sm:$0xff]  ;;  %s3837_s11 = sld [smem:[#allocation15_spill]] }
  0x1c   :  { %1879 = vmatprep.subr.mxu0 %v2954_v5  ;;  %v281_v6 = vld [vmem:[%s3834_s7] sm:$0xff]  ;;  %v284_v11 = vld [vmem:[%s3834_s7 + $0x18] sm:$0xff]  ;;  %v286_v15 = vld [vmem:[%s3834_s7 + $0x28] sm:$0xff] }
  0x1d   :  { %1880 = vmatpush3.msra.mxu0 %v2954_v5  ;;  %v2352_v10 = vpack.c.bf16 %v282_v7, %v281_v6  ;;  %v2355_v13 = vpack.c.bf16 %v284_v11, %v283_v8  ;;  %v285_v14 = vld [vmem:[%s3834_s7 + $0x20] sm:$0xff]  ;;  %v287_v17 = vld [vmem:[%s3834_s7 + $0x30] sm:$0xff]  ;;  %v288_v18 = vld [vmem:[%s3834_s7 + $0x38] sm:$0xff] }
  0x1e   :  { %1884 = vmatprep.subr.mxu0 %v2954_v5  ;;  %v2358_v16 = vpack.c.bf16 %v286_v15, %v285_v14  ;;  %v2361_v19 = vpack.c.bf16 %v288_v18, %v287_v17  ;;  %v289_v20 = vld [vmem:[%s3834_s7 + $0x40] sm:$0xff]  ;;  %v290_v21 = vld [vmem:[%s3834_s7 + $0x48] sm:$0xff]  ;;  %v291_v23 = vld [vmem:[%s3834_s7 + $0x50] sm:$0xff] }
  0x1f   :  { %2353 = vmatpush3.bf16.msra.mxu1 %v2352_v10  ;;  %v2364_v22 = vpack.c.bf16 %v290_v21, %v289_v20  ;;  %v292_v24 = vld [vmem:[%s3834_s7 + $0x58] sm:$0xff]  ;;  %v293_v26 = vld [vmem:[%s3834_s7 + $0x60] sm:$0xff]  ;;  %v294_v27 = vld [vmem:[%s3834_s7 + $0x68] sm:$0xff] }
  0x20   :  { %2354 = vmatprep.subr.bf16.mxu1 %v2791_v9  ;;  %v2367_v25 = vpack.c.bf16 %v292_v24, %v291_v23  ;;  %v2370_v28 = vpack.c.bf16 %v294_v27, %v293_v26  ;;  %v295_v29 = vld [vmem:[%s3834_s7 + $0x70] sm:$0xff]  ;;  %v296_v30 = vld [vmem:[%s3834_s7 + $0x78] sm:$0xff]  ;;  %v384_v31 = vld [vmem:[%s3835_s5] sm:$0xff] }
  0x21   :  { %v385_v32 = vld [vmem:[%s3835_s5 + $0x8] sm:$0xff]  ;;  %v2373_v33 = vpack.c.bf16 %v296_v30, %v295_v29  ;;  %v386_v35 = vld [vmem:[%s3835_s5 + $0x10] sm:$0xff]  ;;  %v387_v36 = vld [vmem:[%s3835_s5 + $0x18] sm:$0xff] }
  0x22   :  { %v2375_v34 = vpack.c.bf16 %v385_v32, %v384_v31  ;;  %v3032_v37 = vld [vmem:[%s3836_s2] sm:$0x1]  ;;  %v2379_v38 = vpack.c.bf16 %v387_v36, %v386_v35  ;;  %v389_v40 = vld [vmem:[%s3835_s5 + $0x28] sm:$0xff]  ;;  %v390_v42 = vld [vmem:[%s3835_s5 + $0x30] sm:$0xff]  ;;  %s3842_s2 = sld [smem:[#allocation19_spill]] }
  0x23   :  { %2356 = vmatpush3.bf16.msra.mxu1 %v2355_v13  ;;  %v388_v39 = vld [vmem:[%s3835_s5 + $0x20] sm:$0xff]  ;;  %v391_v43 = vld [vmem:[%s3835_s5 + $0x38] sm:$0xff]  ;;  %v393_v46 = vld [vmem:[%s3835_s5 + $0x48] sm:$0xff] }
  0x24   :  { %2357 = vmatprep.subr.bf16.mxu1 %v2791_v9  ;;  %v2383_v41 = vpack.c.bf16 %v389_v40, %v388_v39  ;;  %v2387_v44 = vpack.c.bf16 %v391_v43, %v390_v42  ;;  %v392_v45 = vld [vmem:[%s3835_s5 + $0x40] sm:$0xff]  ;;  %v394_v48 = vld [vmem:[%s3835_s5 + $0x50] sm:$0xff]  ;;  %v395_v49 = vld [vmem:[%s3835_s5 + $0x58] sm:$0xff] }
  0x25   :  { %v2391_v47 = vpack.c.bf16 %v393_v46, %v392_v45  ;;  %v2395_v50 = vpack.c.bf16 %v395_v49, %v394_v48  ;;  %v396_v51 = vld [vmem:[%s3835_s5 + $0x60] sm:$0xff]  ;;  %v397_v52 = vld [vmem:[%s3835_s5 + $0x68] sm:$0xff]  ;;  %v398_v0 = vld [vmem:[%s3835_s5 + $0x70] sm:$0xff] }
  0x26   :  { %v2399_v53 = vpack.c.bf16 %v397_v52, %v396_v51  ;;  %v399_v1 = vld [vmem:[%s3835_s5 + $0x78] sm:$0xff]  ;;  %v368_v3 = vld [vmem:[%s3837_s11] sm:$0xff]  ;;  %v369_v4 = vld [vmem:[%s3837_s11 + $0x8] sm:$0xff] }
  0x27   :  { %2359 = vmatpush3.bf16.msra.mxu1 %v2358_v16  ;;  %v2403_v2 = vpack.c.bf16 %v399_v1, %v398_v0  ;;  %v2407_v6 = vpack.c.bf16 %v369_v4, %v368_v3  ;;  %v655_v8 = vld [vmem:[%s3838_s30] sm:$0xff]  ;;  %v656_v10 = vld [vmem:[%s3838_s30 + $0x8] sm:$0xff]  ;;  %v657_v14 = vld [vmem:[%s3838_s30 + $0x10] sm:$0xff] }
  0x28   :  { %2360 = vmatprep.subr.bf16.mxu1 %v2791_v9  ;;  %v2471_v13 = vpack.c.bf16 %v656_v10, %v655_v8  ;;  %v658_v15 = vld [vmem:[%s3838_s30 + $0x18] sm:$0xff]  ;;  %v659_v17 = vld [vmem:[%s3838_s30 + $0x20] sm:$0xff]  ;;  %v660_v18 = vld [vmem:[%s3838_s30 + $0x28] sm:$0xff] }
  0x29   :  { %v2475_v16 = vpack.c.bf16 %v658_v15, %v657_v14  ;;  %v661_v20 = vld [vmem:[%s3838_s30 + $0x30] sm:$0xff]  ;;  %v662_v21 = vld [vmem:[%s3838_s30 + $0x38] sm:$0xff]  ;;  %v663_v23 = vld [vmem:[%s3838_s30 + $0x40] sm:$0xff] }
  0x2a   :  { %v664_v24 = vld [vmem:[%s3838_s30 + $0x48] sm:$0xff]  ;;  %v665_v26 = vld [vmem:[%s3838_s30 + $0x50] sm:$0xff]  ;;  %v666_v27 = vld [vmem:[%s3838_s30 + $0x58] sm:$0xff] }
  0x2b   :  { %2362 = vmatpush3.bf16.msra.mxu1 %v2361_v19  ;;  %v2479_v19 = vpack.c.bf16 %v660_v18, %v659_v17  ;;  %v667_v29 = vld [vmem:[%s3838_s30 + $0x60] sm:$0xff]  ;;  %v668_v30 = vld [vmem:[%s3838_s30 + $0x68] sm:$0xff]  ;;  %v371_v35 = vld [vmem:[%s3837_s11 + $0x18] sm:$0xff] }
  0x2c   :  { %2363 = vmatprep.subr.bf16.mxu1 %v2791_v9  ;;  %v2495_v31 = vpack.c.bf16 %v668_v30, %v667_v29  ;;  %v372_v40 = vld [vmem:[%s3837_s11 + $0x20] sm:$0xff]  ;;  %v374_v43 = vld [vmem:[%s3837_s11 + $0x30] sm:$0xff]  ;;  %v557_v3 = vld [vmem:[%s3839_s10 + $0x28] sm:$0xff] }
  0x2d   :  { %v376_v46 = vld [vmem:[%s3837_s11 + $0x40] sm:$0xff]  ;;  %v378_v49 = vld [vmem:[%s3837_s11 + $0x50] sm:$0xff]  ;;  %v559_v8 = vld [vmem:[%s3839_s10 + $0x38] sm:$0xff] }
  0x2e   :  { %v380_v52 = vld [vmem:[%s3837_s11 + $0x60] sm:$0xff]  ;;  %v562_v15 = vld [vmem:[%s3839_s10 + $0x50] sm:$0xff] }
  0x2f   :  { %2365 = vmatpush3.bf16.msra.mxu1 %v2364_v22  ;;  %v2483_v22 = vpack.c.bf16 %v662_v21, %v661_v20  ;;  %v550_v1 = vld [vmem:[%s3840_s8] sm:$0xff]  ;;  %v566_v21 = vld [vmem:[%s3839_s10 + $0x70] sm:$0xff] }
  0x30   :  { %2366 = vmatprep.subr.bf16.mxu1 %v2791_v9  ;;  %v564_v18 = vld [vmem:[%s3839_s10 + $0x60] sm:$0xff] }
  0x31   :  { %v1641_v29 = vld [vmem:[%s3841_s6] ss:$0 sm:$0xff] }
  0x33   :  { %2368 = vmatpush3.bf16.msra.mxu1 %v2367_v25  ;;  %v2487_v25 = vpack.c.bf16 %v664_v24, %v663_v23  ;;  %v551_v24 = vld [vmem:[%s3840_s8 + $0x8] sm:$0xff]  ;;  %s1594_s8 = sshll.u32 %s2795_s29, 4  ;;  %s1595_s8 = int_to_ptr.vmem [resolvable:$true] %s1594_s8 }
  0x34   :  { %2369 = vmatprep.subr.bf16.mxu1 %v2791_v9 }
  0x37   :  { %2371 = vmatpush3.bf16.msra.mxu1 %v2370_v28  ;;  %v2491_v28 = vpack.c.bf16 %v666_v27, %v665_v26  ;;  %v670_v26 = vld [vmem:[%s3838_s30 + $0x78] sm:$0xff] }
  0x38   :  { %2372 = vmatprep.subr.bf16.mxu1 %v2791_v9 }
  0x3b   :  { %2374 = vmatpush3.bf16.msra.mxu1 %v2373_v33 }
  0x3c   :  { %2376 = vmatprep.subr.bf16.mxu1 %v2375_v34 }
  0x3e   :  { %1922 = vmatmul.mubr.f32.vlgmr.msra.gmra.mrb[0].mxu1 %v3032_v37 }
  0x3f   :  { %2378 = vmatpush3.bf16.msra.mxu1 %v2375_v34  ;;  %v370_v34 = vld [vmem:[%s3837_s11 + $0x10] sm:$0xff] }
  0x40   :  { %2380 = vmatprep.subr.bf16.mxu1 %v2379_v38  ;;  %v2411_v39 = vpack.c.bf16 %v371_v35, %v370_v34 }
  0x43   :  { %2382 = vmatpush3.bf16.msra.mxu1 %v2379_v38 }
  0x44   :  { %2384 = vmatprep.subr.bf16.mxu1 %v2383_v41 }
  0x47   :  { %2386 = vmatpush3.bf16.msra.mxu1 %v2383_v41  ;;  %v373_v41 = vld [vmem:[%s3837_s11 + $0x28] sm:$0xff] }
  0x48   :  { %2388 = vmatprep.subr.bf16.mxu1 %v2387_v44  ;;  %v2415_v42 = vpack.c.bf16 %v373_v41, %v372_v40 }
  0x4b   :  { %2390 = vmatpush3.bf16.msra.mxu1 %v2387_v44  ;;  %v375_v44 = vld [vmem:[%s3837_s11 + $0x38] sm:$0xff] }
  0x4c   :  { %2392 = vmatprep.subr.bf16.mxu1 %v2391_v47  ;;  %v2419_v45 = vpack.c.bf16 %v375_v44, %v374_v43  ;;  %v962_v44 = vld [vmem:[%s3797_s14 + $0x10] sm:$0xff] }
  0x4f   :  { %2394 = vmatpush3.bf16.msra.mxu1 %v2391_v47  ;;  %v377_v47 = vld [vmem:[%s3837_s11 + $0x48] sm:$0xff] }
  0x50   :  { %2396 = vmatprep.subr.bf16.mxu1 %v2395_v50  ;;  %v2423_v48 = vpack.c.bf16 %v377_v47, %v376_v46  ;;  %v964_v47 = vld [vmem:[%s3797_s14 + $0x20] sm:$0xff] }
  0x53   :  { %2398 = vmatpush3.bf16.msra.mxu1 %v2395_v50  ;;  %v379_v50 = vld [vmem:[%s3837_s11 + $0x58] sm:$0xff] }
  0x54   :  { %2400 = vmatprep.subr.bf16.mxu1 %v2399_v53  ;;  %v2427_v51 = vpack.c.bf16 %v379_v50, %v378_v49  ;;  %v966_v50 = vld [vmem:[%s3797_s14 + $0x30] sm:$0xff] }
  0x57   :  { %2402 = vmatpush3.bf16.msra.mxu1 %v2399_v53  ;;  %v381_v53 = vld [vmem:[%s3837_s11 + $0x68] sm:$0xff] }
  0x58   :  { %2404 = vmatprep.subr.bf16.mxu1 %v2403_v2 }
  0x5b   :  { %2406 = vmatpush3.bf16.msra.mxu1 %v2403_v2  ;;  %v556_v2 = vld [vmem:[%s3839_s10 + $0x20] sm:$0xff] }
  0x5c   :  { %2408 = vmatprep.subr.bf16.mxu1 %v2407_v6  ;;  %v2447_v4 = vpack.c.bf16 %v557_v3, %v556_v2 }
  0x94   :  { %v107_v56 = vpop.permute.xlu1 %106  ;;  %v93_v57 = vpop.permute.xlu0 %92 }
  0x95   :  { %vm97_vm2 = vcmp.eq.s32.totalorder %v93_v57, %v88_v55  ;;  %vm111_vm3 = vcmp.eq.s32.totalorder %v107_v56, %v88_v55  ;;  %v382_v56 = vld [vmem:[%s3837_s11 + $0x70] sm:$0xff]  ;;  %v383_v57 = vld [vmem:[%s3837_s11 + $0x78] sm:$0xff] }
  0x96   :  { %v1632_v58 = vsel %vm97_vm2, 1.0, %v2793_v12  ;;  %v1634_v61 = vsel %vm111_vm3, 1.0, %v2793_v12 }
  0x97   :  { %1881 = vmatprep.mubr.msk.f32.mxu0 %vm117_vm1, %v1632_v58  ;;  %v2435_v58 = vpack.c.bf16 %v383_v57, %v382_v56  ;;  %v970_v57 = vld [vmem:[%s3797_s14 + $0x50] sm:$0xff] }
  0x98   :  { %v110_v59 = vpop.permute.xlu1 %109  ;;  %v96_v60 = vpop.permute.xlu0 %95 }
  0x99   :  { %vm98_vm4 = vcmp.eq.s32.totalorder %v96_v60, %v88_v55  ;;  %vm112_vm5 = vcmp.eq.s32.totalorder %v110_v59, %v88_v55  ;;  %v2431_v55 = vpack.c.bf16 %v381_v53, %v380_v52  ;;  %v552_v59 = vld [vmem:[%s3839_s10] sm:$0xff]  ;;  %v553_v60 = vld [vmem:[%s3839_s10 + $0x8] sm:$0xff] }
  0x9a   :  { %v1633_v62 = vsel %vm98_vm4, 1.0, %v2793_v12  ;;  %v1635_v63 = vsel %vm112_vm5, 1.0, %v2793_v12  ;;  %v968_v53 = vld [vmem:[%s3797_s14 + $0x40] sm:$0xff] }
  0x9b   :  { %1882 = vmatmul.mubr.msk.f32.vlgmr.msra.gmra.mrb[0].mxu0 %vm117_vm1, %v1633_v62  ;;  %v554_v62 = vld [vmem:[%s3839_s10 + $0x10] sm:$0xff] }
  0x9c   :  { %1885 = vmatpush3.msra.mxu0 %v2954_v5  ;;  %1886 = vmatprep.mubr.msk.f32.mxu0 %vm117_vm1, %v1634_v61  ;;  %v2439_v61 = vpack.c.bf16 %v553_v60, %v552_v59  ;;  %v972_v60 = vld [vmem:[%s3797_s14 + $0x60] sm:$0xff] }
  0x9d   :  { %2472 = vmatprep.subr.bf16.mxu0 %v2471_v13 }
  0x9f   :  { %1887 = vmatmul.mubr.msk.f32.vlgmr.msra.gmra.mrb[2].mxu0 %vm117_vm1, %v1635_v63  ;;  %v555_v63 = vld [vmem:[%s3839_s10 + $0x18] sm:$0xff] }
  0xa0   :  { %2474 = vmatpush3.bf16.msra.mxu0 %v2471_v13  ;;  %v2443_v0 = vpack.c.bf16 %v555_v63, %v554_v62  ;;  %v561_v13 = vld [vmem:[%s3839_s10 + $0x48] sm:$0xff]  ;;  %v974_v63 = vld [vmem:[%s3797_s14 + $0x70] sm:$0xff] }
  0xa1   :  { %2476 = vmatprep.subr.bf16.mxu0 %v2475_v16 }
  0xa4   :  { %2478 = vmatpush3.bf16.msra.mxu0 %v2475_v16  ;;  %v563_v16 = vld [vmem:[%s3839_s10 + $0x58] sm:$0xff] }
  0xa5   :  { %2480 = vmatprep.subr.bf16.mxu0 %v2479_v19  ;;  %v2459_v17 = vpack.c.bf16 %v563_v16, %v562_v15  ;;  %v857_v16 = vld [vmem:[%s3798_s15] sm:$0xff] }
  0xa8   :  { %2482 = vmatpush3.bf16.msra.mxu0 %v2479_v19  ;;  %v565_v19 = vld [vmem:[%s3839_s10 + $0x68] sm:$0xff] }
  0xa9   :  { %2484 = vmatprep.subr.bf16.mxu0 %v2483_v22  ;;  %v2463_v20 = vpack.c.bf16 %v565_v19, %v564_v18 }
  0xac   :  { %2486 = vmatpush3.bf16.msra.mxu0 %v2483_v22  ;;  %v567_v22 = vld [vmem:[%s3839_s10 + $0x78] sm:$0xff] }
  0xad   :  { %2488 = vmatprep.subr.bf16.mxu0 %v2487_v25  ;;  %v2467_v23 = vpack.c.bf16 %v567_v22, %v566_v21  ;;  %v859_v22 = vld [vmem:[%s3798_s15 + $0x10] sm:$0xff] }
  0xb0   :  { %2490 = vmatpush3.bf16.msra.mxu0 %v2487_v25  ;;  %v669_v25 = vld [vmem:[%s3838_s30 + $0x70] sm:$0xff] }
  0xb1   :  { %2492 = vmatprep.subr.bf16.mxu0 %v2491_v28  ;;  %v2499_v27 = vpack.c.bf16 %v670_v26, %v669_v25  ;;  %v861_v25 = vld [vmem:[%s3798_s15 + $0x20] sm:$0xff]  ;;  %v862_v26 = vld [vmem:[%s3798_s15 + $0x28] sm:$0xff] }
  0xb4   :  { %2494 = vmatpush3.bf16.msra.mxu0 %v2491_v28  ;;  %v3234_v28 = vshrl.u32 %v87_v54, 7 }
  0xb5   :  { %2496 = vmatprep.subr.bf16.mxu0 %v2495_v31 }
  0xb6   :  { %vm773_vm7 = vcmp.eq.s32.totalorder %v3234_v28, %v1641_v29  ;;  %v863_v29 = vld [vmem:[%s3798_s15 + $0x30] sm:$0xff] }
  0xb7   :  { %v3241_v30 = vsel %vm773_vm7, 1.0, %v2793_v12 }
  0xb8   :  { %2498 = vmatpush3.bf16.msra.mxu0 %v2495_v31  ;;  %v777_v31 = vsel %vm776_vm6, %v3241_v30, 0.0 }
  0xb9   :  { %2500 = vmatprep.subr.bf16.mxu0 %v2499_v27  ;;  %778 = vadd.xlane.f32.xlu0 %v777_v31 }
  0xbc   :  { %2502 = vmatpush3.bf16.msra.mxu0 %v2499_v27  ;;  %v2513_v27 = vpack.c.bf16 %v862_v26, %v861_v25  ;;  %v1134_v26 = vld [vmem:[%s3800_s17 + $0x50] sm:$0xff] }
  0xbd   :  { %2503 = vmatprep.subr.bf16.mxu0 %v2791_v9 }
 0x111   :  { %v3083_v7 = vpop.f32.mrb[0].mxu1 }
 0x112   :  { %v1923_v11 = vpop.f32.mrb[1].mxu1 }
 0x113   :  { %v560_v11 = vld [vmem:[%s3839_s10 + $0x40] sm:$0xff] }
 0x114   :  { %v2455_v14 = vpack.c.bf16 %v561_v13, %v560_v11 }
 0x146   :  { %v779_v2 = vpop.xlane.xlu0 %778 }
 0x147   :  { %v780_v3 = vmax.f32 %v779_v2, 1.0  ;;  %v958_v2 = vld [vmem:[%s3796_s13 + $0x70] sm:$0xff] }
 0x149   :  { %2718 = vrcp.f32 %v780_v3  ;;  %v959_v3 = vld [vmem:[%s3796_s13 + $0x78] sm:$0xff] }
 0x16e   :  { %v1883_v32 = vpop.f32.mrb[0].mxu0 }
 0x16f   :  { %v190_v33 = vpop.f32.mrb[1].mxu0 }
 0x172   :  { %v1888_v36 = vpop.f32.mrb[2].mxu0 }
 0x173   :  { %v271_v38 = vpop.f32.mrb[3].mxu0 }
 0x174   :  { %1956 = vmatprep.mubr.f32.mxu1 %v271_v38 }
 0x175   :  { %1957 = vmatmul.mubr.f32.vlgmr.msra.gmra.mrb[2].mxu1 %v1888_v36 }
 0x176   :  { %2410 = vmatpush3.bf16.msra.mxu1 %v2407_v6  ;;  %1991 = vmatprep.mubr.f32.mxu1 %v190_v33  ;;  %v558_v6 = vld [vmem:[%s3839_s10 + $0x30] sm:$0xff]  ;;  %v648_v33 = vsub.s32 0, %v3234_v28 }
 0x177   :  { %2412 = vmatprep.subr.bf16.mxu1 %v2411_v39  ;;  %v2451_v10 = vpack.c.bf16 %v559_v8, %v558_v6  ;;  %v1352_v28 = vld [vmem:[%s3804_s21 + $0x50] sm:$0xff] }
 0x17a   :  { %2414 = vmatpush3.bf16.msra.mxu1 %v2411_v39 }
 0x17b   :  { %2416 = vmatprep.subr.bf16.mxu1 %v2415_v42 }
 0x17e   :  { %2418 = vmatpush3.bf16.msra.mxu1 %v2415_v42  ;;  %v961_v42 = vld [vmem:[%s3797_s14 + $0x8] sm:$0xff] }
 0x17f   :  { %2420 = vmatprep.subr.bf16.mxu1 %v2419_v45 }
 0x182   :  { %2422 = vmatpush3.bf16.msra.mxu1 %v2419_v45  ;;  %v963_v45 = vld [vmem:[%s3797_s14 + $0x18] sm:$0xff] }
 0x183   :  { %2424 = vmatprep.subr.bf16.mxu1 %v2423_v48  ;;  %v2534_v46 = vpack.c.bf16 %v963_v45, %v962_v44  ;;  %v944_v44 = vld [vmem:[%s3796_s13] sm:$0xff]  ;;  %v945_v45 = vld [vmem:[%s3796_s13 + $0x8] sm:$0xff] }
 0x186   :  { %2426 = vmatpush3.bf16.msra.mxu1 %v2423_v48  ;;  %v965_v48 = vld [vmem:[%s3797_s14 + $0x28] sm:$0xff] }
 0x187   :  { %2428 = vmatprep.subr.bf16.mxu1 %v2427_v51  ;;  %v2537_v49 = vpack.c.bf16 %v965_v48, %v964_v47  ;;  %v946_v47 = vld [vmem:[%s3796_s13 + $0x10] sm:$0xff]  ;;  %v947_v48 = vld [vmem:[%s3796_s13 + $0x18] sm:$0xff] }
 0x18a   :  { %2430 = vmatpush3.bf16.msra.mxu1 %v2427_v51  ;;  %v967_v51 = vld [vmem:[%s3797_s14 + $0x38] sm:$0xff] }
 0x18b   :  { %2432 = vmatprep.subr.bf16.mxu1 %v2431_v55  ;;  %v2540_v52 = vpack.c.bf16 %v967_v51, %v966_v50  ;;  %v948_v50 = vld [vmem:[%s3796_s13 + $0x20] sm:$0xff]  ;;  %v949_v51 = vld [vmem:[%s3796_s13 + $0x28] sm:$0xff] }
 0x18e   :  { %2434 = vmatpush3.bf16.msra.mxu1 %v2431_v55  ;;  %v969_v55 = vld [vmem:[%s3797_s14 + $0x48] sm:$0xff] }
 0x18f   :  { %2436 = vmatprep.subr.bf16.mxu1 %v2435_v58  ;;  %v2543_v56 = vpack.c.bf16 %v969_v55, %v968_v53  ;;  %v950_v53 = vld [vmem:[%s3796_s13 + $0x30] sm:$0xff]  ;;  %v951_v55 = vld [vmem:[%s3796_s13 + $0x38] sm:$0xff] }
 0x192   :  { %2438 = vmatpush3.bf16.msra.mxu1 %v2435_v58  ;;  %v971_v58 = vld [vmem:[%s3797_s14 + $0x58] sm:$0xff] }
 0x193   :  { %2440 = vmatprep.subr.bf16.mxu1 %v2439_v61  ;;  %v2546_v59 = vpack.c.bf16 %v971_v58, %v970_v57  ;;  %v952_v57 = vld [vmem:[%s3796_s13 + $0x40] sm:$0xff]  ;;  %v953_v58 = vld [vmem:[%s3796_s13 + $0x48] sm:$0xff] }
 0x195   :  { %1992 = vmatmul.mubr.f32.vlgmr.msra.gmra.mrb[2].mxu1 %v1883_v32  ;;  %v280_v32 = vld [vmem:[%s3842_s2] sm:$0x1] }
 0x196   :  { %2442 = vmatpush3.bf16.msra.mxu1 %v2439_v61  ;;  %2026 = vmatprep.mubr.f32.mxu1 %v550_v1  ;;  %v367_v54 = vadd.f32 %v3083_v7, %v280_v32  ;;  %v960_v7 = vld [vmem:[%s3797_s14] sm:$0xff]  ;;  %v973_v61 = vld [vmem:[%s3797_s14 + $0x68] sm:$0xff] }
 0x197   :  { %2444 = vmatprep.subr.bf16.mxu1 %v2443_v0  ;;  %v2531_v43 = vpack.c.bf16 %v961_v42, %v960_v7  ;;  %v2549_v62 = vpack.c.bf16 %v973_v61, %v972_v60  ;;  %v865_v32 = vld [vmem:[%s3798_s15 + $0x40] sm:$0xff]  ;;  %v871_v7 = vld [vmem:[%s3798_s15 + $0x70] sm:$0xff]  ;;  %v872_v42 = vld [vmem:[%s3798_s15 + $0x78] sm:$0xff] }
 0x198   :  { %v649_v34 = vrot.slane %v367_v54, %v648_v33  ;;  %v866_v54 = vld [vmem:[%s3798_s15 + $0x48] sm:$0xff]  ;;  %v954_v60 = vld [vmem:[%s3796_s13 + $0x50] sm:$0xff]  ;;  %v955_v61 = vld [vmem:[%s3796_s13 + $0x58] sm:$0xff] }
 0x19a   :  { %2446 = vmatpush3.bf16.msra.mxu1 %v2443_v0  ;;  %v975_v0 = vld [vmem:[%s3797_s14 + $0x78] sm:$0xff] }
 0x19b   :  { %2448 = vmatprep.subr.bf16.mxu1 %v2447_v4  ;;  %v2552_v1 = vpack.c.bf16 %v975_v0, %v974_v63  ;;  %v956_v63 = vld [vmem:[%s3796_s13 + $0x60] sm:$0xff]  ;;  %v957_v0 = vld [vmem:[%s3796_s13 + $0x68] sm:$0xff] }
 0x19e   :  { %2450 = vmatpush3.bf16.msra.mxu1 %v2447_v4  ;;  %v1640_v4 = vld [vmem:[%s3795_s12] ss:$0 sm:$0xff]  ;;  %s2794_s12 = smov [#allocation4]  }
 0x19f   :  { %2452 = vmatprep.subr.bf16.mxu1 %v2451_v10  ;;  %s1607_s10 = sshll.u32 %s2794_s12, 4  ;;  %s1608_s10 = int_to_ptr.vmem [resolvable:$true] %s1607_s10 }
 0x1a0   :  { %s2720_s1 = scalar_lea.vmem %s1608_s10, 128  ;;  %p2725_p1 = scmp.lt.s32.totalorder %s1608_s10, %s1608_s10 }
 0x1a1   :  { %p2721_p0 = scmp.ne.s32.totalorder %s1608_s10, %s2720_s1  ;;  %p2726_p2 = scmp.lt.s32.totalorder %s2720_s1, %s2720_s1 }
 0x1a2   :  { %2454 = vmatpush3.bf16.msra.mxu1 %v2451_v10 }
 0x1a3   :  { %2456 = vmatprep.subr.bf16.mxu1 %v2455_v14  ;;  %p2727_p3 = por %p2726_p2, %p2725_p1 }
 0x1a5   :  { %p2728_p4 = pnand %p2727_p3, %p2721_p0 }
 0x1a6   :  { %2458 = vmatpush3.bf16.msra.mxu1 %v2455_v14  ;;  %v2719_v14 = vpop.eup %2718 }
 0x1a7   :  { %2460 = vmatprep.subr.bf16.mxu1 %v2459_v17 }
 0x1aa   :  { %2462 = vmatpush3.bf16.msra.mxu1 %v2459_v17  ;;  %v858_v17 = vld [vmem:[%s3798_s15 + $0x8] sm:$0xff] }
 0x1ab   :  { %2464 = vmatprep.subr.bf16.mxu1 %v2463_v20  ;;  %v2507_v21 = vpack.c.bf16 %v858_v17, %v857_v16  ;;  %v1128_v16 = vld [vmem:[%s3800_s17 + $0x20] sm:$0xff]  ;;  %v1129_v17 = vld [vmem:[%s3800_s17 + $0x28] sm:$0xff] }
 0x1ae   :  { %2466 = vmatpush3.bf16.msra.mxu1 %v2463_v20  ;;  %v782_v20 = vmul.f32 %v2719_v14, %v3241_v30  ;;  %v864_v30 = vld [vmem:[%s3798_s15 + $0x38] sm:$0xff] }
 0x1af   :  { %2468 = vmatprep.subr.bf16.mxu1 %v2467_v23  ;;  %v2516_v31 = vpack.c.bf16 %v864_v30, %v863_v29 }
 0x1b2   :  { %2470 = vmatpush3.bf16.msra.mxu1 %v2467_v23  ;;  %v860_v23 = vld [vmem:[%s3798_s15 + $0x18] sm:$0xff] }
 0x1b3   :  { %2530 = vmatprep.subr.bf16.mxu1 %v2791_v9 }
 0x1b5   :  { %2027 = vmatmul.mubr.f32.vlgmr.msra.gmra.mrb[2].mxu1 %v551_v24  ;;  %v2510_v24 = vpack.c.bf16 %v860_v23, %v859_v22  ;;  %v1132_v23 = vld [vmem:[%s3800_s17 + $0x40] sm:$0xff] }
 0x1b6   :  { %2138 = vmatprep.mubr.msk.f32.mxu1 %vm2792_vm0, %v2793_v12  ;;  %2532 = vmatpush3.bf16.msra.mxu1 %v2531_v43  ;;  %v2528_v43 = vpack.c.bf16 %v872_v42, %v871_v7  ;;  %v1240_v7 = vld [vmem:[%s3802_s19 + $0x8] sm:$0xff]  ;;  %v1241_v42 = vld [vmem:[%s3802_s19 + $0x10] sm:$0xff] }
 0x1b7   :  { %2533 = vmatprep.subr.bf16.mxu1 %v2791_v9 }
 0x1ba   :  { %2535 = vmatpush3.bf16.msra.mxu1 %v2534_v46  ;;  %v2555_v46 = vpack.c.bf16 %v945_v45, %v944_v44  ;;  %v1242_v44 = vld [vmem:[%s3802_s19 + $0x18] sm:$0xff] }
 0x1bb   :  { %2536 = vmatprep.subr.bf16.mxu1 %v2791_v9  ;;  %v2606_v45 = vpack.c.bf16 %v1242_v44, %v1241_v42  ;;  %v1505_v42 = vld [vmem:[%s3806_s23 + $0x28] sm:$0xff]  ;;  %v1506_v44 = vld [vmem:[%s3806_s23 + $0x30] sm:$0xff] }
 0x1be   :  { %2538 = vmatpush3.bf16.msra.mxu1 %v2537_v49  ;;  %v2558_v49 = vpack.c.bf16 %v947_v48, %v946_v47  ;;  %v1244_v47 = vld [vmem:[%s3802_s19 + $0x28] sm:$0xff] }
 0x1bf   :  { %2539 = vmatprep.subr.bf16.mxu1 %v2791_v9 }
 0x1c2   :  { %2541 = vmatpush3.bf16.msra.mxu1 %v2540_v52  ;;  %v2561_v52 = vpack.c.bf16 %v949_v51, %v948_v50  ;;  %v1246_v50 = vld [vmem:[%s3802_s19 + $0x38] sm:$0xff] }
 0x1c3   :  { %2542 = vmatprep.subr.bf16.mxu1 %v2791_v9 }
 0x1c6   :  { %2544 = vmatpush3.bf16.msra.mxu1 %v2543_v56  ;;  %v2564_v56 = vpack.c.bf16 %v951_v55, %v950_v53  ;;  %v1248_v53 = vld [vmem:[%s3802_s19 + $0x48] sm:$0xff] }
 0x1c7   :  { %2545 = vmatprep.subr.bf16.mxu1 %v2791_v9 }
 0x1ca   :  { %2547 = vmatpush3.bf16.msra.mxu1 %v2546_v59  ;;  %v2567_v59 = vpack.c.bf16 %v953_v58, %v952_v57  ;;  %v1250_v57 = vld [vmem:[%s3802_s19 + $0x58] sm:$0xff] }
 0x1cb   :  { %2548 = vmatprep.subr.bf16.mxu1 %v2791_v9 }
 0x1ce   :  { %2550 = vmatpush3.bf16.msra.mxu1 %v2549_v62  ;;  %v2570_v62 = vpack.c.bf16 %v955_v61, %v954_v60  ;;  %v1252_v60 = vld [vmem:[%s3802_s19 + $0x68] sm:$0xff] }
 0x1cf   :  { %2551 = vmatprep.subr.bf16.mxu1 %v2791_v9 }
 0x1d2   :  { %2553 = vmatpush3.bf16.msra.mxu1 %v2552_v1  ;;  %v2573_v1 = vpack.c.bf16 %v957_v0, %v956_v63  ;;  %v1254_v63 = vld [vmem:[%s3802_s19 + $0x78] sm:$0xff] }
 0x1d3   :  { %2578 = vmatprep.subr.bf16.mxu1 %v2791_v9 }
 0x288   :  { %v2028_v35 = vpop.f32.mrb[2].mxu1 }
 0x289   :  { %v652_v36 = vadd.f32 %v2028_v35, %v649_v34  ;;  %v634_v38 = vpop.f32.mrb[3].mxu1  ;;  %v867_v35 = vld [vmem:[%s3798_s15 + $0x50] sm:$0xff] }
 0x28a   :  { %v651_v39 = vadd.f32 %v649_v34, %v634_v38  ;;  %v2519_v34 = vpack.c.bf16 %v866_v54, %v865_v32  ;;  %v1136_v32 = vld [vmem:[%s3800_s17 + $0x60] sm:$0xff]  ;;  %v1137_v54 = vld [vmem:[%s3800_s17 + $0x68] sm:$0xff] }
 0x28b   :  { %v654_v41 = vmax.f32 %v652_v36, 0.0  ;;  %v868_v36 = vld [vmem:[%s3798_s15 + $0x58] sm:$0xff] }
 0x28c   :  { %v653_v40 = vmax.f32 %v651_v39, 0.0  ;;  %v2522_v38 = vpack.c.bf16 %v868_v36, %v867_v35  ;;  %v869_v39 = vld [vmem:[%s3798_s15 + $0x60] sm:$0xff] }
 0x28e   :  { %2061 = vmatprep.mubr.f32.mxu0 %v653_v40  ;;  %v870_v40 = vld [vmem:[%s3798_s15 + $0x68] sm:$0xff] }
 0x28f   :  { %2062 = vmatmul.mubr.f32.vlgmr.msra.gmra.mrb[4].mxu0 %v654_v41  ;;  %v2525_v41 = vpack.c.bf16 %v870_v40, %v869_v39  ;;  %v1139_v39 = vld [vmem:[%s3800_s17 + $0x78] sm:$0xff] }
 0x290   :  { %2068 = vmatprep.mubr.msk.f32.mxu0 %vm2792_vm0, %v2793_v12 }
 0x362   :  { %v2063_v6 = vpop.f32.mrb[4].mxu0 }
 0x363   :  { %v750_v8 = vadd.f32 %v2063_v6, %v1640_v4  ;;  %v744_v10 = vpop.f32.mrb[5].mxu0  ;;  %v1124_v6 = vld [vmem:[%s3800_s17] sm:$0xff] }
 0x364   :  { %v745_v11 = vadd.f32 %v1640_v4, %v744_v10  ;;  %v2576_v4 = vpack.c.bf16 %v959_v3, %v958_v2  ;;  %v1343_v2 = vld [vmem:[%s3804_s21 + $0x8] sm:$0xff] }
 0x365   :  { %v754_v13 = vmax.f32 %v750_v8, 0.0  ;;  %v1125_v8 = vld [vmem:[%s3800_s17 + $0x8] sm:$0xff] }
 0x366   :  { %v753_v15 = vmax.f32 %v745_v11, 0.0  ;;  %v2579_v10 = vpack.c.bf16 %v1125_v8, %v1124_v6  ;;  %v1126_v11 = vld [vmem:[%s3800_s17 + $0x10] sm:$0xff]  ;;  %v1345_v6 = vld [vmem:[%s3804_s21 + $0x18] sm:$0xff] }
 0x367   :  { %767 = vst [vmem:[#allocation2 + $0x8] sm:$0xff] %v754_v13 }
 0x368   :  { %766 = vst [vmem:[#allocation2] sm:$0xff] %v753_v15  ;;  %v2504_v18 = vpack.c.bf16 %v754_v13, %v753_v15  ;;  %v3319_v19 = vadd.f32 %v754_v13, %v753_v15 }
 0x36a   :  { %2505 = vmatpush3.bf16.msra.mxu0 %v2504_v18  ;;  %v2585_v18 = vpack.c.bf16 %v1129_v17, %v1128_v16 }
 0x36b   :  { %2506 = vmatprep.subr.bf16.mxu0 %v2791_v9 }
 0x36d   :  { %2069 = vmatmul.mubr.msk.f32.vlgmr.msra.gmra.mrb[6].mxu0 %vm776_vm6, %v782_v20  ;;  %v1130_v20 = vld [vmem:[%s3800_s17 + $0x30] sm:$0xff] }
 0x36e   :  { %2508 = vmatpush3.bf16.msra.mxu0 %v2507_v21  ;;  %2103 = vmatprep.mubr.msk.f32.mxu0 %vm2792_vm0, %v2793_v12  ;;  %v1131_v21 = vld [vmem:[%s3800_s17 + $0x38] sm:$0xff] }
 0x36f   :  { %2509 = vmatprep.subr.bf16.mxu0 %v2791_v9  ;;  %v2588_v22 = vpack.c.bf16 %v1131_v21, %v1130_v20 }
 0x372   :  { %2511 = vmatpush3.bf16.msra.mxu0 %v2510_v24  ;;  %v1133_v24 = vld [vmem:[%s3800_s17 + $0x48] sm:$0xff] }
 0x373   :  { %2512 = vmatprep.subr.bf16.mxu0 %v2791_v9  ;;  %v2591_v25 = vpack.c.bf16 %v1133_v24, %v1132_v23  ;;  %v1350_v24 = vld [vmem:[%s3804_s21 + $0x40] sm:$0xff] }
 0x376   :  { %2514 = vmatpush3.bf16.msra.mxu0 %v2513_v27  ;;  %v1135_v27 = vld [vmem:[%s3800_s17 + $0x58] sm:$0xff] }
 0x377   :  { %2515 = vmatprep.subr.bf16.mxu0 %v2791_v9  ;;  %v2594_v29 = vpack.c.bf16 %v1135_v27, %v1134_v26 }
 0x37a   :  { %2517 = vmatpush3.bf16.msra.mxu0 %v2516_v31 }
 0x37b   :  { %2518 = vmatprep.subr.bf16.mxu0 %v2791_v9 }
 0x37e   :  { %2520 = vmatpush3.bf16.msra.mxu0 %v2519_v34  ;;  %v2597_v34 = vpack.c.bf16 %v1137_v54, %v1136_v32  ;;  %v1356_v32 = vld [vmem:[%s3804_s21 + $0x70] sm:$0xff]  ;;  %v1357_v54 = vld [vmem:[%s3804_s21 + $0x78] sm:$0xff] }
 0x37f   :  { %2521 = vmatprep.subr.bf16.mxu0 %v2791_v9 }
 0x382   :  { %2523 = vmatpush3.bf16.msra.mxu0 %v2522_v38  ;;  %v1138_v38 = vld [vmem:[%s3800_s17 + $0x70] sm:$0xff] }
 0x383   :  { %2524 = vmatprep.subr.bf16.mxu0 %v2791_v9  ;;  %v2600_v40 = vpack.c.bf16 %v1139_v39, %v1138_v38  ;;  %v1502_v38 = vld [vmem:[%s3806_s23 + $0x10] sm:$0xff] }
 0x386   :  { %2526 = vmatpush3.bf16.msra.mxu0 %v2525_v41  ;;  %v1239_v41 = vld [vmem:[%s3802_s19] sm:$0xff] }
 0x387   :  { %2527 = vmatprep.subr.bf16.mxu0 %v2791_v9 }
 0x38a   :  { %2529 = vmatpush3.bf16.msra.mxu0 %v2528_v43  ;;  %v2603_v43 = vpack.c.bf16 %v1240_v7, %v1239_v41  ;;  %v1504_v7 = vld [vmem:[%s3806_s23 + $0x20] sm:$0xff] }
 0x38b   :  { %2554 = vmatprep.subr.bf16.mxu0 %v2791_v9 }
 0x38d   :  { %2104 = vmatmul.mubr.f32.vlgmr.msra.gmra.mrb[8].mxu0 %v3032_v37 }
 0x38e   :  { %2556 = vmatpush3.bf16.msra.mxu0 %v2555_v46  ;;  %2173 = vmatprep.mubr.msk.f32.mxu0 %vm2792_vm0, %v2793_v12  ;;  %v1243_v46 = vld [vmem:[%s3802_s19 + $0x20] sm:$0xff] }
 0x38f   :  { %2557 = vmatprep.subr.bf16.mxu0 %v2791_v9  ;;  %v2609_v48 = vpack.c.bf16 %v1244_v47, %v1243_v46  ;;  %v1508_v47 = vld [vmem:[%s3806_s23 + $0x40] sm:$0xff] }
 0x392   :  { %2559 = vmatpush3.bf16.msra.mxu0 %v2558_v49  ;;  %v1245_v49 = vld [vmem:[%s3802_s19 + $0x30] sm:$0xff] }
 0x393   :  { %2560 = vmatprep.subr.bf16.mxu0 %v2791_v9  ;;  %v2612_v51 = vpack.c.bf16 %v1246_v50, %v1245_v49  ;;  %v1510_v50 = vld [vmem:[%s3806_s23 + $0x50] sm:$0xff] }
 0x396   :  { %2562 = vmatpush3.bf16.msra.mxu0 %v2561_v52  ;;  %v1247_v52 = vld [vmem:[%s3802_s19 + $0x40] sm:$0xff] }
 0x397   :  { %2563 = vmatprep.subr.bf16.mxu0 %v2791_v9  ;;  %v2615_v55 = vpack.c.bf16 %v1248_v53, %v1247_v52  ;;  %v1512_v53 = vld [vmem:[%s3806_s23 + $0x60] sm:$0xff] }
 0x39a   :  { %2565 = vmatpush3.bf16.msra.mxu0 %v2564_v56  ;;  %v1249_v56 = vld [vmem:[%s3802_s19 + $0x50] sm:$0xff] }
 0x39b   :  { %2566 = vmatprep.subr.bf16.mxu0 %v2791_v9  ;;  %v2618_v58 = vpack.c.bf16 %v1250_v57, %v1249_v56  ;;  %v1644_v57 = vld [vmem:[%s3801_s18] ss:$0 sm:$0xff] }
 0x39e   :  { %2568 = vmatpush3.bf16.msra.mxu0 %v2567_v59  ;;  %v1251_v59 = vld [vmem:[%s3802_s19 + $0x60] sm:$0xff] }
 0x39f   :  { %2569 = vmatprep.subr.bf16.mxu0 %v2791_v9  ;;  %v2621_v61 = vpack.c.bf16 %v1252_v60, %v1251_v59 }
 0x3a2   :  { %2571 = vmatpush3.bf16.msra.mxu0 %v2570_v62  ;;  %v1253_v62 = vld [vmem:[%s3802_s19 + $0x70] sm:$0xff] }
 0x3a3   :  { %2572 = vmatprep.subr.bf16.mxu0 %v2791_v9  ;;  %v2624_v0 = vpack.c.bf16 %v1254_v63, %v1253_v62 }
 0x3a6   :  { %2574 = vmatpush3.bf16.msra.mxu0 %v2573_v1  ;;  %v1342_v1 = vld [vmem:[%s3804_s21] sm:$0xff] }
 0x3a7   :  { %2575 = vmatprep.subr.bf16.mxu0 %v2791_v9  ;;  %v2627_v3 = vpack.c.bf16 %v1343_v2, %v1342_v1 }
 0x3aa   :  { %2577 = vmatpush3.bf16.msra.mxu0 %v2576_v4  ;;  %v1344_v4 = vld [vmem:[%s3804_s21 + $0x10] sm:$0xff] }
 0x3ab   :  { %2602 = vmatprep.subr.bf16.mxu0 %v2791_v9  ;;  %v2630_v8 = vpack.c.bf16 %v1345_v6, %v1344_v4  ;;  %v1327_v4 = vld [vmem:[%s3803_s20 + $0x8] sm:$0xff] }
 0x3ad   :  { %2174 = vmatmul.mubr.f32.vlgmr.msra.gmra.mrb[10].mxu0 %v2954_v5  ;;  %v1127_v5 = vld [vmem:[%s3800_s17 + $0x18] sm:$0xff] }
 0x3ae   :  { %2243 = vmatprep.mubr.msk.f32.mxu0 %vm2792_vm0, %v2793_v12  ;;  %v2582_v15 = vpack.c.bf16 %v1127_v5, %v1126_v11  ;;  %2604 = vmatpush3.bf16.msra.mxu0 %v2603_v43  ;;  %v1347_v11 = vld [vmem:[%s3804_s21 + $0x28] sm:$0xff]  ;;  %v2681_v43 = vpack.c.bf16 %v1505_v42, %v1504_v7 }
 0x3af   :  { %2605 = vmatprep.subr.bf16.mxu0 %v2791_v9 }
 0x3b2   :  { %2607 = vmatpush3.bf16.msra.mxu0 %v2606_v45  ;;  %v1507_v45 = vld [vmem:[%s3806_s23 + $0x38] sm:$0xff] }
 0x3b3   :  { %2608 = vmatprep.subr.bf16.mxu0 %v2791_v9  ;;  %v2684_v46 = vpack.c.bf16 %v1507_v45, %v1506_v44 }
 0x3b6   :  { %2610 = vmatpush3.bf16.msra.mxu0 %v2609_v48  ;;  %v1509_v48 = vld [vmem:[%s3806_s23 + $0x48] sm:$0xff] }
 0x3b7   :  { %2611 = vmatprep.subr.bf16.mxu0 %v2791_v9  ;;  %v2687_v49 = vpack.c.bf16 %v1509_v48, %v1508_v47 }
 0x3ba   :  { %2613 = vmatpush3.bf16.msra.mxu0 %v2612_v51  ;;  %v1511_v51 = vld [vmem:[%s3806_s23 + $0x58] sm:$0xff] }
 0x3bb   :  { %2614 = vmatprep.subr.bf16.mxu0 %v2791_v9  ;;  %v2690_v52 = vpack.c.bf16 %v1511_v51, %v1510_v50 }
 0x3be   :  { %2616 = vmatpush3.bf16.msra.mxu0 %v2615_v55  ;;  %v1513_v55 = vld [vmem:[%s3806_s23 + $0x68] sm:$0xff] }
 0x3bf   :  { %2617 = vmatprep.subr.bf16.mxu0 %v2791_v9  ;;  %v2693_v56 = vpack.c.bf16 %v1513_v55, %v1512_v53 }
 0x3c2   :  { %2619 = vmatpush3.bf16.msra.mxu0 %v2618_v58 }
 0x3c3   :  { %2620 = vmatprep.subr.bf16.mxu0 %v2791_v9 }
 0x3c6   :  { %2622 = vmatpush3.bf16.msra.mxu0 %v2621_v61 }
 0x3c7   :  { %2623 = vmatprep.subr.bf16.mxu0 %v2791_v9 }
 0x3ca   :  { %2625 = vmatpush3.bf16.msra.mxu0 %v2624_v0 }
 0x3cb   :  { %2626 = vmatprep.subr.bf16.mxu0 %v2791_v9 }
 0x3cd   :  { %2244 = vmatmul.mubr.f32.vlgmr.msra.gmra.mrb[12].mxu0 %v3032_v37  ;;  %v1348_v37 = vld [vmem:[%s3804_s21 + $0x30] sm:$0xff] }
 0x3ce   :  { %2628 = vmatpush3.bf16.msra.mxu0 %v2627_v3  ;;  %2278 = vmatprep.mubr.msk.f32.mxu0 %vm2792_vm0, %v2793_v12  ;;  %v1326_v3 = vld [vmem:[%s3803_s20] sm:$0xff] }
 0x3cf   :  { %2629 = vmatprep.subr.bf16.mxu0 %v2791_v9 }
 0x3d2   :  { %2631 = vmatpush3.bf16.msra.mxu0 %v2630_v8  ;;  %v2651_v8 = vpack.c.bf16 %v1327_v4, %v1326_v3 }
 0x3d3   :  { %2632 = vmatprep.subr.bf16.mxu0 %v2791_v9 }
 0x440   :  { %v852_v13 = vpop.f32.mrb[6].mxu0 }
 0x441   :  { %v2070_v14 = vpop.f32.mrb[7].mxu0  ;;  %2139 = vmatmul.mubr.f32.vlgmr.msra.gmra.mrb[4].mxu1 %v852_v13  ;;  %v1349_v13 = vld [vmem:[%s3804_s21 + $0x38] sm:$0xff] }
 0x442   :  { %2580 = vmatpush3.bf16.msra.mxu1 %v2579_v10  ;;  %2208 = vmatprep.mubr.msk.f32.mxu1 %vm2792_vm0, %v2793_v12  ;;  %v1346_v10 = vld [vmem:[%s3804_s21 + $0x20] sm:$0xff]  ;;  %v2636_v14 = vpack.c.bf16 %v1349_v13, %v1348_v37 }
 0x443   :  { %2581 = vmatprep.subr.bf16.mxu1 %v2791_v9  ;;  %v2633_v5 = vpack.c.bf16 %v1347_v11, %v1346_v10  ;;  %v1328_v11 = vld [vmem:[%s3803_s20 + $0x10] sm:$0xff]  ;;  %v1330_v13 = vld [vmem:[%s3803_s20 + $0x20] sm:$0xff] }
 0x445   :  { %2634 = vmatpush3.bf16.msra.mxu0 %v2633_v5  ;;  %v1329_v5 = vld [vmem:[%s3803_s20 + $0x18] sm:$0xff] }
 0x446   :  { %2583 = vmatpush3.bf16.msra.mxu1 %v2582_v15  ;;  %2635 = vmatprep.subr.bf16.mxu0 %v2791_v9  ;;  %v856_v15 = vld [vmem:[%s3799_s16] sm:$0x1]  ;;  %v2654_v37 = vpack.c.bf16 %v1329_v5, %v1328_v11 }
 0x447   :  { %2584 = vmatprep.subr.bf16.mxu1 %v2791_v9 }
 0x449   :  { %2637 = vmatpush3.bf16.msra.mxu0 %v2636_v14  ;;  %v1331_v14 = vld [vmem:[%s3803_s20 + $0x28] sm:$0xff] }
 0x44a   :  { %2586 = vmatpush3.bf16.msra.mxu1 %v2585_v18  ;;  %2638 = vmatprep.subr.bf16.mxu0 %v2791_v9 }
 0x44b   :  { %2587 = vmatprep.subr.bf16.mxu1 %v2791_v9 }
 0x44e   :  { %2589 = vmatpush3.bf16.msra.mxu1 %v2588_v22 }
 0x44f   :  { %2590 = vmatprep.subr.bf16.mxu1 %v2791_v9 }
 0x452   :  { %2592 = vmatpush3.bf16.msra.mxu1 %v2591_v25  ;;  %v1351_v25 = vld [vmem:[%s3804_s21 + $0x48] sm:$0xff] }
 0x453   :  { %2593 = vmatprep.subr.bf16.mxu1 %v2791_v9  ;;  %v2639_v26 = vpack.c.bf16 %v1351_v25, %v1350_v24  ;;  %v1336_v25 = vld [vmem:[%s3803_s20 + $0x50] sm:$0xff] }
 0x455   :  { %2640 = vmatpush3.bf16.msra.mxu0 %v2639_v26 }
 0x456   :  { %2595 = vmatpush3.bf16.msra.mxu1 %v2594_v29  ;;  %2641 = vmatprep.subr.bf16.mxu0 %v2791_v9  ;;  %v1354_v29 = vld [vmem:[%s3804_s21 + $0x60] sm:$0xff] }
 0x457   :  { %2596 = vmatprep.subr.bf16.mxu1 %v2791_v9 }
 0x45a   :  { %2598 = vmatpush3.bf16.msra.mxu1 %v2597_v34  ;;  %v2648_v34 = vpack.c.bf16 %v1357_v54, %v1356_v32 }
 0x45b   :  { %2599 = vmatprep.subr.bf16.mxu1 %v2791_v9 }
 0x45e   :  { %2601 = vmatpush3.bf16.msra.mxu1 %v2600_v40  ;;  %v1503_v40 = vld [vmem:[%s3806_s23 + $0x18] sm:$0xff] }
 0x45f   :  { %2674 = vmatprep.subr.bf16.mxu1 %v2791_v9  ;;  %v2678_v41 = vpack.c.bf16 %v1503_v40, %v1502_v38  ;;  %v1515_v38 = vld [vmem:[%s3806_s23 + $0x78] sm:$0xff]  ;;  %v1238_v40 = vld [vmem:[%s3805_s22] sm:$0x1] }
 0x460   :  { %v3482_v30 = vpop.f32.mrb[8].mxu0 }
 0x461   :  { %v2105_v31 = vpop.f32.mrb[9].mxu0  ;;  %v943_v16 = vadd.f32 %v3482_v30, %v856_v15  ;;  %v1355_v30 = vld [vmem:[%s3804_s21 + $0x68] sm:$0xff]  ;;  %v2657_v15 = vpack.c.bf16 %v1331_v14, %v1330_v13 }
 0x462   :  { %v2645_v31 = vpack.c.bf16 %v1355_v30, %v1354_v29  ;;  %v1340_v30 = vld [vmem:[%s3803_s20 + $0x70] sm:$0xff] }
 0x463   :  { %v1120_v18 = vrot.slane %v943_v16, %v648_v33  ;;  %v1353_v33 = vld [vmem:[%s3804_s21 + $0x58] sm:$0xff]  ;;  %v1224_v16 = vrot.slane %v3319_v19, 4 }
 0x464   :  { %v2642_v27 = vpack.c.bf16 %v1353_v33, %v1352_v28  ;;  %v1338_v33 = vld [vmem:[%s3803_s20 + $0x60] sm:$0xff] }
 0x466   :  { %2643 = vmatpush3.bf16.msra.mxu0 %v2642_v27  ;;  %v1339_v27 = vld [vmem:[%s3803_s20 + $0x68] sm:$0xff] }
 0x467   :  { %2644 = vmatprep.subr.bf16.mxu0 %v2791_v9  ;;  %v2669_v29 = vpack.c.bf16 %v1339_v27, %v1338_v33 }
 0x46a   :  { %2646 = vmatpush3.bf16.msra.mxu0 %v2645_v31  ;;  %v1341_v31 = vld [vmem:[%s3803_s20 + $0x78] sm:$0xff] }
 0x46b   :  { %2647 = vmatprep.subr.bf16.mxu0 %v2791_v9  ;;  %v2672_v54 = vpack.c.bf16 %v1341_v31, %v1340_v30 }
 0x46e   :  { %2649 = vmatpush3.bf16.msra.mxu0 %v2648_v34 }
 0x46f   :  { %2650 = vmatprep.subr.bf16.mxu0 %v2791_v9 }
 0x480   :  { %v3490_v35 = vpop.f32.mrb[10].mxu0 }
 0x481   :  { %v2175_v36 = vpop.f32.mrb[11].mxu0 }
 0x482   :  { %v1501_v36 = vld [vmem:[%s3806_s23 + $0x8] sm:$0xff] }
 0x514   :  { %v1042_v17 = vpop.f32.mrb[4].mxu1 }
 0x515   :  { %v1113_v20 = vadd.f32 %v3490_v35, %v1042_v17  ;;  %v2140_v21 = vpop.f32.mrb[5].mxu1  ;;  %v1500_v35 = vld [vmem:[%s3806_s23] sm:$0xff]  ;;  %v1333_v17 = vld [vmem:[%s3803_s20 + $0x38] sm:$0xff] }
 0x516   :  { %v2675_v39 = vpack.c.bf16 %v1501_v36, %v1500_v35  ;;  %v1334_v21 = vld [vmem:[%s3803_s20 + $0x40] sm:$0xff]  ;;  %v1514_v36 = vld [vmem:[%s3806_s23 + $0x70] sm:$0xff] }
 0x517   :  { %v1122_v22 = vadd.f32 %v1120_v18, %v1113_v20  ;;  %v1225_v20 = vadd.f32 %v1224_v16, %v3319_v19  ;;  %v1337_v19 = vld [vmem:[%s3803_s20 + $0x58] sm:$0xff] }
 0x518   :  { %v2666_v26 = vpack.c.bf16 %v1337_v19, %v1336_v25 }
 0x519   :  { %v1123_v23 = vmax.f32 %v1122_v22, 0.0  ;;  %v1335_v22 = vld [vmem:[%s3803_s20 + $0x48] sm:$0xff]  ;;  %v1226_v24 = vrot.slane %v1225_v20, 2 }
 0x51b   :  { %2209 = vmatmul.mubr.f32.vlgmr.msra.gmra.mrb[6].mxu1 %v1123_v23  ;;  %v2663_v23 = vpack.c.bf16 %v1335_v22, %v1334_v21  ;;  %v1227_v28 = vadd.f32 %v1226_v24, %v1225_v20 }
 0x51c   :  { %2348 = vmatprep.mubr.msk.f32.mxu1 %vm2792_vm0, %v2793_v12  ;;  %2676 = vmatpush3.bf16.msra.mxu1 %v2675_v39  ;;  %v2696_v39 = vpack.c.bf16 %v1515_v38, %v1514_v36 }
 0x51d   :  { %2677 = vmatprep.subr.bf16.mxu1 %v2791_v9  ;;  %v1228_v32 = vrot.slane %v1227_v28, 1 }
 0x51f   :  { %v1229_v34 = vadd.f32 %v1228_v32, %v1227_v28 }
 0x520   :  { %2679 = vmatpush3.bf16.msra.mxu1 %v2678_v41 }
 0x521   :  { %2680 = vmatprep.subr.bf16.mxu1 %v2791_v9  ;;  %v1230_v35 = vmul.f32 0.0625, %v1229_v34 }
 0x524   :  { %2682 = vmatpush3.bf16.msra.mxu1 %v2681_v43 }
 0x525   :  { %2683 = vmatprep.subr.bf16.mxu1 %v2791_v9 }
 0x528   :  { %2685 = vmatpush3.bf16.msra.mxu1 %v2684_v46 }
 0x529   :  { %2686 = vmatprep.subr.bf16.mxu1 %v2791_v9 }
 0x52c   :  { %2688 = vmatpush3.bf16.msra.mxu1 %v2687_v49 }
 0x52d   :  { %2689 = vmatprep.subr.bf16.mxu1 %v2791_v9 }
 0x530   :  { %2691 = vmatpush3.bf16.msra.mxu1 %v2690_v52 }
 0x531   :  { %2692 = vmatprep.subr.bf16.mxu1 %v2791_v9 }
 0x534   :  { %2694 = vmatpush3.bf16.msra.mxu1 %v2693_v56 }
 0x535   :  { %2695 = vmatprep.subr.bf16.mxu1 %v2791_v9 }
 0x538   :  { %2697 = vmatpush3.bf16.msra.mxu1 %v2696_v39 }
 0x5ee   :  { %v1213_v58 = vpop.f32.mrb[6].mxu1 }
 0x5ef   :  { %v1214_v59 = vadd.f32 %v1644_v57, %v1213_v58  ;;  %v2210_v60 = vpop.f32.mrb[7].mxu1 }
 0x5f1   :  { %v1217_v61 = vmax.f32 %v1214_v59, 0.0 }
 0x5f3   :  { %v1231_v62 = vrot.slane %v1217_v61, 4  ;;  %1222 = vst [vmem:[#allocation4] sm:$0xff] %v1217_v61 }
 0x5f5   :  { %v1232_v63 = vadd.f32 %v1231_v62, %v1217_v61 }
 0x5f7   :  { %v1233_v0 = vrot.slane %v1232_v63, 2 }
 0x5f9   :  { %v1234_v1 = vadd.f32 %v1233_v0, %v1232_v63 }
 0x5fb   :  { %v1235_v2 = vrot.slane %v1234_v1, 1 }
 0x5fd   :  { %v1236_v6 = vadd.f32 %v1235_v2, %v1234_v1 }
 0x5ff   :  { %v1237_v10 = vmul.f32 0.125, %v1236_v6 }
 0x601   :  { %2279 = vmatmul.mubr.f32.vlgmr.msra.gmra.mrb[12].mxu0 %v1237_v10 }
 0x602   :  { %2652 = vmatpush3.bf16.msra.mxu0 %v2651_v8  ;;  %2313 = vmatprep.mubr.msk.f32.mxu0 %vm2792_vm0, %v2793_v12  ;;  %v1332_v12 = vld [vmem:[%s3803_s20 + $0x30] sm:$0xff] }
 0x603   :  { %2653 = vmatprep.subr.bf16.mxu0 %v2791_v9  ;;  %v2660_v18 = vpack.c.bf16 %v1333_v17, %v1332_v12 }
 0x606   :  { %2655 = vmatpush3.bf16.msra.mxu0 %v2654_v37 }
 0x607   :  { %2656 = vmatprep.subr.bf16.mxu0 %v2791_v9 }
 0x60a   :  { %2658 = vmatpush3.bf16.msra.mxu0 %v2657_v15 }
 0x60b   :  { %2659 = vmatprep.subr.bf16.mxu0 %v2791_v9 }
 0x60e   :  { %2661 = vmatpush3.bf16.msra.mxu0 %v2660_v18 }
 0x60f   :  { %2662 = vmatprep.subr.bf16.mxu0 %v2791_v9 }
 0x612   :  { %2664 = vmatpush3.bf16.msra.mxu0 %v2663_v23 }
 0x613   :  { %2665 = vmatprep.subr.bf16.mxu0 %v2791_v9 }
 0x616   :  { %2667 = vmatpush3.bf16.msra.mxu0 %v2666_v26 }
 0x617   :  { %2668 = vmatprep.subr.bf16.mxu0 %v2791_v9 }
 0x61a   :  { %2670 = vmatpush3.bf16.msra.mxu0 %v2669_v29 }
 0x61b   :  { %2671 = vmatprep.subr.bf16.mxu0 %v2791_v9 }
 0x61e   :  { %2673 = vmatpush3.bf16.msra.mxu0 %v2672_v54 }
 0x621   :  { %2314 = vmatmul.mubr.f32.vlgmr.msra.gmra.mrb[12].mxu0 %v1230_v35 }
 0x6f4   :  { %v1494_v41 = vpop.f32.mrb[12].mxu0 }
 0x6f5   :  { %v2698_v9 = vadd.f32 %v1494_v41, %v1238_v40  ;;  %v2315_v7 = vpop.f32.mrb[13].mxu0 }
 0x6f7   :  { %v1499_v42 = vmax.f32 %v2698_v9, 0.0 }
 0x6f9   :  { %2349 = vmatmul.mubr.f32.vlgmr.msra.gmra.mrb[8].mxu1 %v1499_v42 }
 0x6fa   :  { %2731 = shalt.err (!%p2728_p4)
}
 0x6fb   :  { %s2732_s22 = scalar_lea.hbm %s3809_s26, 128 }
 0x6fc   :  { %p2733_p5 = scmp.ne.s32.totalorder %s3809_s26, %s2732_s22  ;;  %p2736_p6 = scmp.lt.u32.totalorder %s2732_s22, %s3809_s26 }
 0x6fe   :  { %p2738_p7 = pnand %p2736_p6, %p2733_p5 }
 0x700   :  { %2741 = shalt.err (!%p2738_p7)
}
 0x701   :  { %1610 = dma.vmem_to_hbm [thread:$0]  %s1608_s10, 128, %s3809_s26, [#allocation5]  }
 0x702   :  { %s2742_s21 = scalar_lea.vmem %s1595_s8, 256  ;;  %p2747_p9 = scmp.lt.s32.totalorder %s1595_s8, %s1595_s8 }
 0x703   :  { %p2743_p8 = scmp.ne.s32.totalorder %s1595_s8, %s2742_s21  ;;  %p2748_p10 = scmp.lt.s32.totalorder %s2742_s21, %s2742_s21 }
 0x705   :  { %p2749_p11 = por %p2748_p10, %p2747_p9 }
 0x707   :  { %p2750_p12 = pnand %p2749_p11, %p2743_p8 }
 0x709   :  { %2753 = shalt.err (!%p2750_p12)
}
 0x70a   :  { %s2754_s18 = scalar_lea.hbm %s3808_s25, 256 }
 0x70b   :  { %p2755_p13 = scmp.ne.s32.totalorder %s3808_s25, %s2754_s18  ;;  %p2758_p0 = scmp.lt.u32.totalorder %s2754_s18, %s3808_s25 }
 0x70d   :  { %p2760_p1 = pnand %p2758_p0, %p2755_p13 }
 0x70f   :  { %2763 = shalt.err (!%p2760_p1)
}
 0x710   :  { %s2796_s26 = smov 128   ;;  %s2797_s28 = smov 8   ;;  %v1516_v43 = vld [vmem:[%s3807_s24] sm:$0x1] }
 0x711   :  { %1600 = dma.vmem_to_hbm [thread:$0]  %s1595_s8, 256, %s3808_s25, [#allocation3], %s2796_s26, %s2796_s26, %s2797_s28  }
 0x712   :  { %s2798_s12 = smov [#allocation6]  }
 0x713   :  { %s1617_s10 = sshll.u32 %s2798_s12, 4  ;;  %s1618_s10 = int_to_ptr.vmem [resolvable:$true] %s1617_s10 }
 0x714   :  { %s2764_s29 = scalar_lea.vmem %s1618_s10, 16  ;;  %s2768_s1 = scalar_lea.vmem %s1618_s10, 32 }
 0x715   :  { %p2765_p2 = scmp.ne.s32.totalorder %s1618_s10, %s2764_s29  ;;  %p2769_p3 = scmp.lt.s32.totalorder %s1618_s10, %s1618_s10 }
 0x716   :  { %p2770_p4 = scmp.lt.s32.totalorder %s2768_s1, %s2764_s29 }
 0x718   :  { %p2771_p5 = por %p2770_p4, %p2769_p3 }
 0x71a   :  { %p2772_p6 = pnand %p2771_p5, %p2765_p2 }
 0x7cc   :  { %v1583_v44 = vpop.f32.mrb[8].mxu1 }
 0x7cd   :  { %v1584_v45 = vadd.f32 %v1583_v44, %v1516_v43  ;;  %v2350_v46 = vpop.f32.mrb[9].mxu1 }
 0x7cf   :  { %v1587_v47 = vmax.f32 %v1584_v45, 0.0 }
 0x7d1   :  { %1588 = vst [vmem:[#allocation6] sm:$0x1] %v1587_v47 }
 0x7d2   :  { %2775 = shalt.err (!%p2772_p6)
}
 0x7d3   :  { %s2776_s24 = scalar_lea.hbm %s3810_s27, 16 }
 0x7d4   :  { %p2777_p7 = scmp.ne.s32.totalorder %s3810_s27, %s2776_s24  ;;  %p2780_p8 = scmp.lt.u32.totalorder %s2776_s24, %s3810_s27 }
 0x7d6   :  { %p2782_p9 = pnand %p2780_p8, %p2777_p7 }
 0x7d8   :  { %2785 = shalt.err (!%p2782_p9)
}
 0x7d9   :  { %1620 = dma.vmem_to_hbm [thread:$0]  %s1618_s10, 16, %s3810_s27, [#allocation5]  }
 0x7da   :  { %2786 = dma.done.wait [#allocation3], 256  }
 0x7db   :  { %2787 = vsyncadd [#allocation3], 4294967040 }
 0x7dc   :  { %2788 = dma.done.wait [#allocation5], 144  }
 0x7dd   :  { %2789 = vsyncadd [#allocation5], 4294967152 }
 0x7de   :  { %1630 = vsyncpa [#allocation3], 1 }
 0x7df   :  { %1631 = vsyncpa [#allocation5], 1 }

</bundles_post_ra>
